<compile_context>
chip_gen: v7x
topology: tpu7x:2x2x1
jax: 0.10.0
libtpu: 0.0.40
codegen_flags: <defaults>
</compile_context>

<pallas_src>
import functools
import math

import numpy as np
import jax
import jax.numpy as jnp
from jax.experimental import pallas as pl
from jax.experimental.pallas import tpu as pltpu

# ------------------------------- hyper-params --------------------------------
D_MODEL = 32     # d_model
D_INNER = 64     # d_inner_hid
N_HEAD = 2       # n_head
D_K = 8          # d_k
D_V = 8          # d_v
N_EXPERTS = 4    # num_experts
N_LAYERS = 2     # layers
LN_EPS = 1e-5

ED = N_EXPERTS * D_MODEL          # 128 == one full lane tile
NPROJ = 3 * N_HEAD * D_K          # 48 real projection rows (q/k/v x heads)
WROWS = 64                        # padded projection-row count (multiple of 8)

# ---- packed parameter slab layout (per layer, 128 lanes, 8-row aligned) ------
ROW_F1W = 0                       # (D_MODEL, D_INNER)     rows   0:32, cols 0:64
ROW_F2W = 32                      # (D_INNER, D_MODEL)     rows  32:96, cols 0:32
ROW_WOW = 96                      # (N_HEAD*D_V, D_MODEL)  rows  96:112, cols 0:32
ROW_VEC = 112                     # one aligned 8x128 tile of all vector params
SLAB_ROWS = 120

# rows inside the vector tile
VEC_WOB, VEC_LN1G, VEC_LN1B, VEC_F1B, VEC_F2B, VEC_LN2G, VEC_LN2B = range(7)


def _layer_norm(x, gamma, beta, eps=LN_EPS):
    mu = jnp.mean(x, axis=-1, keepdims=True)
    var = jnp.mean((x - mu) ** 2, axis=-1, keepdims=True)
    return (x - mu) * jax.lax.rsqrt(var + eps) * gamma + beta


# ------------------------------- Pallas kernel --------------------------------
def encoder_kernel(x_ref, gate_ref, w_ref, slab_ref, out_ref, *, bb, t):
    """One grid step: `bb` batch elements x `t` tokens through both layers.

    x_ref    : (bb*t, D)           token-flattened self-attention input
    gate_ref : (bb, L, 128)        expanded MoE gate per batch element / layer
    w_ref    : (L, 64, 128)        fused q/k/v per-head projection weights (transposed)
    slab_ref : (L, 120, 128)       FFN / w_o / LayerNorm / bias slab (8-row aligned)
    """
    f32 = jnp.float32
    inv_temper = 1.0 / math.sqrt(D_MODEL)       # ScaledDotProductAttention: sqrt(d_model)

    x = x_ref[...].astype(f32)                  # (bb*t, D)

    for layer in range(N_LAYERS):
        # ---- mixture-of-experts projection: ONE fused MXU dot for q/k/v, all heads
        # per-token expanded gate (bb*t, 128) from the per-batch (1, 128) rows
        gate_tok = jnp.concatenate(
            [jnp.broadcast_to(gate_ref[b:b + 1, layer, :], (t, ED)) for b in range(bb)],
            axis=0)
        xg = jnp.concatenate([x] * N_EXPERTS, axis=1) * gate_tok        # (bb*t, 128)
        proj = jax.lax.dot_general(xg, w_ref[layer], (((1,), (1,)), ((), ())),
                                   preferred_element_type=f32)          # (bb*t, 64)

        # one aligned (8,128) read of all vector params for this layer
        vec = slab_ref[layer, ROW_VEC:ROW_VEC + 8, :]

        # ---- per-(batch, head) scaled-dot-product attention -------------------
        o_rows = []
        for b in range(bb):
            r0 = b * t
            heads = []
            for hh in range(N_HEAD):
                q_h = proj[r0:r0 + t, hh * D_K:(hh + 1) * D_K]
                k_h = proj[r0:r0 + t, (N_HEAD + hh) * D_K:(N_HEAD + hh + 1) * D_K]
                v_h = proj[r0:r0 + t, (2 * N_HEAD + hh) * D_V:(2 * N_HEAD + hh + 1) * D_V]
                s = jax.lax.dot_general(q_h, k_h, (((1,), (1,)), ((), ())),
                                        preferred_element_type=f32) * inv_temper
                s = s - jnp.max(s, axis=-1, keepdims=True)
                p = jnp.exp(s)
                p = p * pl.reciprocal(jnp.sum(p, axis=-1, keepdims=True), approx=True)
                heads.append(jnp.dot(p, v_h, preferred_element_type=f32))   # (t, d_v)
            o_rows.append(jnp.concatenate(heads, axis=1))                   # (t, H*d_v)
        o_all = jnp.concatenate(o_rows, axis=0)                             # (bb*t, 16)

        # ---- merged w_o projection (single dot) + residual + LayerNorm --------
        wo_w = slab_ref[layer, ROW_WOW:ROW_WOW + N_HEAD * D_V, 0:D_MODEL]   # (16, 32)
        mha = (jnp.dot(o_all, wo_w, preferred_element_type=f32)
               + vec[VEC_WOB:VEC_WOB + 1, 0:D_MODEL])
        y = _layer_norm(mha + x,
                        vec[VEC_LN1G:VEC_LN1G + 1, 0:D_MODEL],
                        vec[VEC_LN1B:VEC_LN1B + 1, 0:D_MODEL])

        # ---- PositionwiseFeedForward (1x1 convs) + residual + LayerNorm -------
        f1_w = slab_ref[layer, ROW_F1W:ROW_F1W + D_MODEL, 0:D_INNER]        # (32, 64)
        f2_w = slab_ref[layer, ROW_F2W:ROW_F2W + D_INNER, 0:D_MODEL]        # (64, 32)
        h1 = jnp.maximum(jnp.dot(y, f1_w, preferred_element_type=f32)
                         + vec[VEC_F1B:VEC_F1B + 1, 0:D_INNER], 0.0)
        h2 = (jnp.dot(h1, f2_w, preferred_element_type=f32)
              + vec[VEC_F2B:VEC_F2B + 1, 0:D_MODEL])
        x = _layer_norm(h2 + y,
                        vec[VEC_LN2G:VEC_LN2G + 1, 0:D_MODEL],
                        vec[VEC_LN2B:VEC_LN2B + 1, 0:D_MODEL])

    out_ref[...] = x.astype(out_ref.dtype)


# ------------------------------- host-side packing -----------------------------
def pack_layer_params(layer_params):
    """Pack per-layer params into a fused (L,64,128) projection matrix and a
    (L,120,128) 8-row-aligned slab."""
    w_layers, slab_layers = [], []
    for p in layer_params:
        pn = {k: np.asarray(v, dtype=np.float32) for k, v in p.items()}

        # fused projection: row group i = (qkv*N_HEAD + head), each D_K rows,
        # W_all[i*D_K + r, e*D + d] = w[e, d, head*D_K + r]
        w_all = np.zeros((WROWS, ED), np.float32)
        idx = 0
        for w in (pn["wq"], pn["wk"], pn["wv"]):                 # (E, D, H*d_k)
            for hh in range(N_HEAD):
                w_h = w[:, :, hh * D_K:(hh + 1) * D_K]           # (E, D, d_k)
                w_all[idx:idx + D_K] = np.transpose(w_h, (2, 0, 1)).reshape(D_K, ED)
                idx += D_K
        assert idx == NPROJ
        w_layers.append(w_all)

        slab = np.zeros((SLAB_ROWS, ED), np.float32)
        slab[ROW_F1W:ROW_F1W + D_MODEL, 0:D_INNER] = pn["f1_w"]
        slab[ROW_F2W:ROW_F2W + D_INNER, 0:D_MODEL] = pn["f2_w"]
        slab[ROW_WOW:ROW_WOW + N_HEAD * D_V, 0:D_MODEL] = pn["wo_w"]
        slab[ROW_VEC + VEC_WOB, 0:D_MODEL] = pn["wo_b"][0]
        slab[ROW_VEC + VEC_LN1G, 0:D_MODEL] = pn["ln1_g"][0]
        slab[ROW_VEC + VEC_LN1B, 0:D_MODEL] = pn["ln1_b"][0]
        slab[ROW_VEC + VEC_F1B, 0:D_INNER] = pn["f1_b"][0]
        slab[ROW_VEC + VEC_F2B, 0:D_MODEL] = pn["f2_b"][0]
        slab[ROW_VEC + VEC_LN2G, 0:D_MODEL] = pn["ln2_g"][0]
        slab[ROW_VEC + VEC_LN2B, 0:D_MODEL] = pn["ln2_b"][0]
        slab_layers.append(slab)

    return jnp.asarray(np.stack(w_layers)), jnp.asarray(np.stack(slab_layers))


def compute_gates(x1, layer_params):
    """Expanded MoE gates (B, L, E*D), hoisted out of the kernel.

    The gate depends only on x1 (layer-invariant) and static ta_* params, so it
    is computed once with plain JAX and fed to the kernel as one small
    lane-dense input (removes the x1 DMA stream and per-layer gate math)."""
    xm = jnp.mean(x1.astype(jnp.float32), axis=1)                 # (B, D)
    gs = []
    for p in layer_params:
        h = jnp.maximum(xm @ p["ta_w1"] + p["ta_b1"][0], 0.0)
        g = jax.nn.sigmoid(h @ p["ta_w2"] + p["ta_b2"][0])        # (B, E)
        gs.append(jnp.repeat(g, D_MODEL, axis=1))                 # (B, E*D)
    return jnp.stack(gs, axis=1)                                  # (B, L, E*D)


def _pick_batch_block(batch, max_bb=16):
    if batch <= max_bb:
        return batch
    return max(d for d in range(1, max_bb + 1) if batch % d == 0)


# ------------------------------- wrapper ---------------------------------------
def encoder_pallas(x0, x1, layer_params):
    B, T, D = x0.shape
    assert D == D_MODEL and len(layer_params) == N_LAYERS
    w_all, slab = pack_layer_params(layer_params)   # (L,64,128), (L,120,128)
    gates = compute_gates(x1, layer_params)         # (B, L, 128)

    Bb = _pick_batch_block(B)                       # batch chunk per grid step
    grid = (B // Bb,)
    ntok = Bb * T

    kernel = functools.partial(encoder_kernel, bb=Bb, t=T)

    out_flat = pl.pallas_call(
        kernel,
        out_shape=jax.ShapeDtypeStruct((B * T, D), x0.dtype),
        grid=grid,
        in_specs=[
            pl.BlockSpec((ntok, D), lambda i: (i, 0)),
            pl.BlockSpec((Bb, N_LAYERS, ED), lambda i: (i, 0, 0)),
            pl.BlockSpec(w_all.shape, lambda i: (0, 0, 0)),
            pl.BlockSpec(slab.shape, lambda i: (0, 0, 0)),
        ],
        out_specs=pl.BlockSpec((ntok, D), lambda i: (i, 0)),
        compiler_params=pltpu.CompilerParams(dimension_semantics=("parallel",)),
    )(x0.reshape(B * T, D), gates, w_all, slab)

    return out_flat.reshape(B, T, D)


# ------------------------------- pure-JAX reference ----------------------------
def encoder_layer_ref(x0, x1, p):
    temper = math.sqrt(D_MODEL)
    xm = jnp.mean(x1, axis=1)                                           # (B, D)
    h = jnp.maximum(xm @ p["ta_w1"] + p["ta_b1"][0], 0.0)
    gate = jax.nn.sigmoid(h @ p["ta_w2"] + p["ta_b2"][0])               # (B, E)

    def proj(wstack):
        wmix = jnp.einsum("be,edr->bdr", gate, wstack)
        return jnp.einsum("btd,bdr->btr", x0, wmix)

    qs, ks, vs = proj(p["wq"]), proj(p["wk"]), proj(p["wv"])
    heads = []
    for hh in range(N_HEAD):
        q_h = qs[..., hh * D_K:(hh + 1) * D_K]
        k_h = ks[..., hh * D_K:(hh + 1) * D_K]
        v_h = vs[..., hh * D_V:(hh + 1) * D_V]
        s = jnp.einsum("btd,bsd->bts", q_h, k_h) / temper
        a = jax.nn.softmax(s, axis=-1)
        heads.append(jnp.einsum("bts,bsd->btd", a, v_h))
    head = jnp.concatenate(heads, axis=-1)
    mha = head @ p["wo_w"] + p["wo_b"][0]
    mha = _layer_norm(mha + x0, p["ln1_g"][0], p["ln1_b"][0])
    h1 = jnp.maximum(mha @ p["f1_w"] + p["f1_b"][0], 0.0)
    h2 = h1 @ p["f2_w"] + p["f2_b"][0]
    return _layer_norm(h2 + mha, p["ln2_g"][0], p["ln2_b"][0])


def encoder_ref(x0, x1, layer_params):
    for p in layer_params:
        x0 = encoder_layer_ref(x0, x1, p)
    return x0


# ------------------------------- params / main ---------------------------------
def init_layer_params(key):
    ks = jax.random.split(key, 12)
    s = 0.1
    f32 = jnp.float32
    return {
        # expert-stacked projection weights (E, D, n_head*d)
        "wq": jax.random.normal(ks[0], (N_EXPERTS, D_MODEL, N_HEAD * D_K), f32) * s,
        "wk": jax.random.normal(ks[1], (N_EXPERTS, D_MODEL, N_HEAD * D_K), f32) * s,
        "wv": jax.random.normal(ks[2], (N_EXPERTS, D_MODEL, N_HEAD * D_V), f32) * s,
        "ta_w1": jax.random.normal(ks[3], (D_MODEL, N_EXPERTS), f32) * s,
        "ta_b1": jax.random.normal(ks[4], (1, N_EXPERTS), f32) * s,
        "ta_w2": jax.random.normal(ks[5], (N_EXPERTS, N_EXPERTS), f32) * s,
        "ta_b2": jax.random.normal(ks[6], (1, N_EXPERTS), f32) * s,
        "wo_w": jax.random.normal(ks[7], (N_HEAD * D_V, D_MODEL), f32) * s,
        "wo_b": jax.random.normal(ks[8], (1, D_MODEL), f32) * s,
        "ln1_g": jnp.ones((1, D_MODEL), f32),
        "ln1_b": jnp.zeros((1, D_MODEL), f32),
        "f1_w": jax.random.normal(ks[9], (D_MODEL, D_INNER), f32) * s,
        "f1_b": jax.random.normal(ks[10], (1, D_INNER), f32) * s,
        "f2_w": jax.random.normal(ks[11], (D_INNER, D_MODEL), f32) * s,
        "f2_b": jnp.zeros((1, D_MODEL), f32),
        "ln2_g": jnp.ones((1, D_MODEL), f32),
        "ln2_b": jnp.zeros((1, D_MODEL), f32),
    }


if __name__ == "__main__":
    key = jax.random.PRNGKey(0)
    k_x0, k_x1, k_p = jax.random.split(key, 3)
    B, T = 2, 8
    # Encoder input is a pair [x0, x1]: x0 feeds self-attention, x1 feeds the gate.
    x0 = jax.random.normal(k_x0, (B, T, D_MODEL), jnp.float32)
    x1 = jax.random.normal(k_x1, (B, T, D_MODEL), jnp.float32)

    layer_params = [init_layer_params(k) for k in jax.random.split(k_p, N_LAYERS)]

    out = encoder_pallas(x0, x1, layer_params)
    out = jax.block_until_ready(out)

    ref = encoder_ref(x0, x1, layer_params)
    err = float(jnp.max(jnp.abs(out - ref)))
    assert out.shape == (B, T, D_MODEL)
    assert err < 5e-2, f"mismatch vs pure-JAX reference: max abs err = {err}"
    print("KERNEL_OK")
</pallas_src>

<mosaic_0001>
module attributes {stable_mosaic.version = 11 : i64} {
  func.func @encoder_kernel(%arg0: i32, %arg1: memref<16x32xf32, #tpu.memory_space<vmem>>, %arg2: memref<2x2x128xf32, #tpu.memory_space<vmem>>, %arg3: memref<2x64x128xf32, #tpu.memory_space<vmem>>, %arg4: memref<2x120x128xf32, #tpu.memory_space<vmem>>, %arg5: memref<16x32xf32, #tpu.memory_space<vmem>>) attributes {dimension_semantics = [#tpu.dimension_semantics<parallel>], iteration_bounds = array<i64: 1>, scalar_prefetch = 0 : i64, scratch_operands = 0 : i64, tpu.core_type = #tpu.core_type<tc>, window_params = [{transform_indices = @transform_0, window_bounds = array<i64: 16, 32>}, {transform_indices = @transform_1, window_bounds = array<i64: 2, 2, 128>}, {pipeline_mode = #tpu.pipeline_mode<synchronous>, transform_indices = @transform_2, window_bounds = array<i64: 2, 64, 128>}, {pipeline_mode = #tpu.pipeline_mode<synchronous>, transform_indices = @transform_3, window_bounds = array<i64: 2, 120, 128>}, {transform_indices = @transform_4, window_bounds = array<i64: 16, 32>}]} {
    %c0 = arith.constant 0 : index
    %c0_0 = arith.constant 0 : index
    %0 = vector.load %arg1[%c0, %c0_0] : memref<16x32xf32, #tpu.memory_space<vmem>>, vector<16x32xf32>
    %c0_1 = arith.constant 0 : index
    %c0_2 = arith.constant 0 : index
    %c0_3 = arith.constant 0 : index
    %1 = vector.load %arg2[%c0_1, %c0_2, %c0_3] : memref<2x2x128xf32, #tpu.memory_space<vmem>>, vector<1x1x128xf32>
    %2 = vector.shape_cast %1 : vector<1x1x128xf32> to vector<1x128xf32>
    %3 = vector.shape_cast %2 : vector<1x128xf32> to vector<1x128xf32>
    %4 = vector.broadcast %3 : vector<1x128xf32> to vector<8x128xf32>
    %c1 = arith.constant 1 : index
    %c0_4 = arith.constant 0 : index
    %c0_5 = arith.constant 0 : index
    %5 = vector.load %arg2[%c1, %c0_4, %c0_5] : memref<2x2x128xf32, #tpu.memory_space<vmem>>, vector<1x1x128xf32>
    %6 = vector.shape_cast %5 : vector<1x1x128xf32> to vector<1x128xf32>
    %7 = vector.shape_cast %6 : vector<1x128xf32> to vector<1x128xf32>
    %8 = vector.broadcast %7 : vector<1x128xf32> to vector<8x128xf32>
    %9 = tpu.concatenate %4, %8 in 0 : vector<8x128xf32>, vector<8x128xf32> -> vector<16x128xf32>
    %10 = tpu.concatenate %0, %0, %0, %0 in 1 : vector<16x32xf32>, vector<16x32xf32>, vector<16x32xf32>, vector<16x32xf32> -> vector<16x128xf32>
    %11 = arith.mulf %10, %9 : vector<16x128xf32>
    %c0_6 = arith.constant 0 : index
    %c0_7 = arith.constant 0 : index
    %c0_8 = arith.constant 0 : index
    %12 = vector.load %arg3[%c0_6, %c0_7, %c0_8] : memref<2x64x128xf32, #tpu.memory_space<vmem>>, vector<1x64x128xf32>
    %13 = vector.shape_cast %12 : vector<1x64x128xf32> to vector<64x128xf32>
    %cst = arith.constant dense<0.000000e+00> : vector<16x64xf32>
    %14 = tpu.matmul %11, %13, %cst {dimension_numbers = #tpu.dot_dimension_numbers<[1], [1], [0], [0], [0, 0, 1, 0], [], []>} : vector<16x128xf32>, vector<64x128xf32>, vector<16x64xf32> -> vector<16x64xf32>
    %c0_9 = arith.constant 0 : index
    %c112 = arith.constant 112 : index
    %c0_10 = arith.constant 0 : index
    %15 = vector.load %arg4[%c0_9, %c112, %c0_10] : memref<2x120x128xf32, #tpu.memory_space<vmem>>, vector<1x8x128xf32>
    %16 = vector.shape_cast %15 : vector<1x8x128xf32> to vector<8x128xf32>
    %17 = vector.extract_strided_slice %14 {offsets = [0, 0], sizes = [8, 8], strides = [1, 1]} : vector<16x64xf32> to vector<8x8xf32>
    %18 = vector.extract_strided_slice %14 {offsets = [0, 16], sizes = [8, 8], strides = [1, 1]} : vector<16x64xf32> to vector<8x8xf32>
    %19 = vector.extract_strided_slice %14 {offsets = [0, 32], sizes = [8, 8], strides = [1, 1]} : vector<16x64xf32> to vector<8x8xf32>
    %cst_11 = arith.constant dense<0.000000e+00> : vector<8x8xf32>
    %20 = tpu.matmul %17, %18, %cst_11 {dimension_numbers = #tpu.dot_dimension_numbers<[1], [1], [0], [0], [0, 0, 1, 0], [], []>} : vector<8x8xf32>, vector<8x8xf32>, vector<8x8xf32> -> vector<8x8xf32>
    %cst_12 = arith.constant 0.176776692 : f32
    %21 = vector.broadcast %cst_12 : f32 to vector<8x8xf32>
    %22 = arith.mulf %20, %21 : vector<8x8xf32>
    %cst_13 = arith.constant dense<0xFF800000> : vector<8xf32>
    %23 = vector.multi_reduction <maximumf>, %22, %cst_13 [1] : vector<8x8xf32> to vector<8xf32>
    %24 = vector.shape_cast %23 : vector<8xf32> to vector<8x1xf32>
    %25 = vector.broadcast %24 : vector<8x1xf32> to vector<8x8xf32>
    %26 = arith.subf %22, %25 : vector<8x8xf32>
    %27 = math.exp %26 : vector<8x8xf32>
    %cst_14 = arith.constant dense<0.000000e+00> : vector<8xf32>
    %28 = vector.multi_reduction <add>, %27, %cst_14 [1] : vector<8x8xf32> to vector<8xf32>
    %29 = vector.shape_cast %28 : vector<8xf32> to vector<8x1xf32>
    %30 = tpu.reciprocal %29 {approx = true} : vector<8x1xf32> -> vector<8x1xf32>
    %31 = vector.broadcast %30 : vector<8x1xf32> to vector<8x8xf32>
    %32 = arith.mulf %27, %31 : vector<8x8xf32>
    %cst_15 = arith.constant dense<0.000000e+00> : vector<8x8xf32>
    %33 = tpu.matmul %32, %19, %cst_15 {dimension_numbers = #tpu.dot_dimension_numbers<[1], [0], [0], [1], [0, 0, 1, 1], [], []>} : vector<8x8xf32>, vector<8x8xf32>, vector<8x8xf32> -> vector<8x8xf32>
    %34 = vector.extract_strided_slice %14 {offsets = [0, 8], sizes = [8, 8], strides = [1, 1]} : vector<16x64xf32> to vector<8x8xf32>
    %35 = vector.extract_strided_slice %14 {offsets = [0, 24], sizes = [8, 8], strides = [1, 1]} : vector<16x64xf32> to vector<8x8xf32>
    %36 = vector.extract_strided_slice %14 {offsets = [0, 40], sizes = [8, 8], strides = [1, 1]} : vector<16x64xf32> to vector<8x8xf32>
    %cst_16 = arith.constant dense<0.000000e+00> : vector<8x8xf32>
    %37 = tpu.matmul %34, %35, %cst_16 {dimension_numbers = #tpu.dot_dimension_numbers<[1], [1], [0], [0], [0, 0, 1, 0], [], []>} : vector<8x8xf32>, vector<8x8xf32>, vector<8x8xf32> -> vector<8x8xf32>
    %cst_17 = arith.constant 0.176776692 : f32
    %38 = vector.broadcast %cst_17 : f32 to vector<8x8xf32>
    %39 = arith.mulf %37, %38 : vector<8x8xf32>
    %cst_18 = arith.constant dense<0xFF800000> : vector<8xf32>
    %40 = vector.multi_reduction <maximumf>, %39, %cst_18 [1] : vector<8x8xf32> to vector<8xf32>
    %41 = vector.shape_cast %40 : vector<8xf32> to vector<8x1xf32>
    %42 = vector.broadcast %41 : vector<8x1xf32> to vector<8x8xf32>
    %43 = arith.subf %39, %42 : vector<8x8xf32>
    %44 = math.exp %43 : vector<8x8xf32>
    %cst_19 = arith.constant dense<0.000000e+00> : vector<8xf32>
    %45 = vector.multi_reduction <add>, %44, %cst_19 [1] : vector<8x8xf32> to vector<8xf32>
    %46 = vector.shape_cast %45 : vector<8xf32> to vector<8x1xf32>
    %47 = tpu.reciprocal %46 {approx = true} : vector<8x1xf32> -> vector<8x1xf32>
    %48 = vector.broadcast %47 : vector<8x1xf32> to vector<8x8xf32>
    %49 = arith.mulf %44, %48 : vector<8x8xf32>
    %cst_20 = arith.constant dense<0.000000e+00> : vector<8x8xf32>
    %50 = tpu.matmul %49, %36, %cst_20 {dimension_numbers = #tpu.dot_dimension_numbers<[1], [0], [0], [1], [0, 0, 1, 1], [], []>} : vector<8x8xf32>, vector<8x8xf32>, vector<8x8xf32> -> vector<8x8xf32>
    %51 = tpu.concatenate %33, %50 in 1 : vector<8x8xf32>, vector<8x8xf32> -> vector<8x16xf32>
    %52 = vector.extract_strided_slice %14 {offsets = [8, 0], sizes = [8, 8], strides = [1, 1]} : vector<16x64xf32> to vector<8x8xf32>
    %53 = vector.extract_strided_slice %14 {offsets = [8, 16], sizes = [8, 8], strides = [1, 1]} : vector<16x64xf32> to vector<8x8xf32>
    %54 = vector.extract_strided_slice %14 {offsets = [8, 32], sizes = [8, 8], strides = [1, 1]} : vector<16x64xf32> to vector<8x8xf32>
    %cst_21 = arith.constant dense<0.000000e+00> : vector<8x8xf32>
    %55 = tpu.matmul %52, %53, %cst_21 {dimension_numbers = #tpu.dot_dimension_numbers<[1], [1], [0], [0], [0, 0, 1, 0], [], []>} : vector<8x8xf32>, vector<8x8xf32>, vector<8x8xf32> -> vector<8x8xf32>
    %cst_22 = arith.constant 0.176776692 : f32
    %56 = vector.broadcast %cst_22 : f32 to vector<8x8xf32>
    %57 = arith.mulf %55, %56 : vector<8x8xf32>
    %cst_23 = arith.constant dense<0xFF800000> : vector<8xf32>
    %58 = vector.multi_reduction <maximumf>, %57, %cst_23 [1] : vector<8x8xf32> to vector<8xf32>
    %59 = vector.shape_cast %58 : vector<8xf32> to vector<8x1xf32>
    %60 = vector.broadcast %59 : vector<8x1xf32> to vector<8x8xf32>
    %61 = arith.subf %57, %60 : vector<8x8xf32>
    %62 = math.exp %61 : vector<8x8xf32>
    %cst_24 = arith.constant dense<0.000000e+00> : vector<8xf32>
    %63 = vector.multi_reduction <add>, %62, %cst_24 [1] : vector<8x8xf32> to vector<8xf32>
    %64 = vector.shape_cast %63 : vector<8xf32> to vector<8x1xf32>
    %65 = tpu.reciprocal %64 {approx = true} : vector<8x1xf32> -> vector<8x1xf32>
    %66 = vector.broadcast %65 : vector<8x1xf32> to vector<8x8xf32>
    %67 = arith.mulf %62, %66 : vector<8x8xf32>
    %cst_25 = arith.constant dense<0.000000e+00> : vector<8x8xf32>
    %68 = tpu.matmul %67, %54, %cst_25 {dimension_numbers = #tpu.dot_dimension_numbers<[1], [0], [0], [1], [0, 0, 1, 1], [], []>} : vector<8x8xf32>, vector<8x8xf32>, vector<8x8xf32> -> vector<8x8xf32>
    %69 = vector.extract_strided_slice %14 {offsets = [8, 8], sizes = [8, 8], strides = [1, 1]} : vector<16x64xf32> to vector<8x8xf32>
    %70 = vector.extract_strided_slice %14 {offsets = [8, 24], sizes = [8, 8], strides = [1, 1]} : vector<16x64xf32> to vector<8x8xf32>
    %71 = vector.extract_strided_slice %14 {offsets = [8, 40], sizes = [8, 8], strides = [1, 1]} : vector<16x64xf32> to vector<8x8xf32>
    %cst_26 = arith.constant dense<0.000000e+00> : vector<8x8xf32>
    %72 = tpu.matmul %69, %70, %cst_26 {dimension_numbers = #tpu.dot_dimension_numbers<[1], [1], [0], [0], [0, 0, 1, 0], [], []>} : vector<8x8xf32>, vector<8x8xf32>, vector<8x8xf32> -> vector<8x8xf32>
    %cst_27 = arith.constant 0.176776692 : f32
    %73 = vector.broadcast %cst_27 : f32 to vector<8x8xf32>
    %74 = arith.mulf %72, %73 : vector<8x8xf32>
    %cst_28 = arith.constant dense<0xFF800000> : vector<8xf32>
    %75 = vector.multi_reduction <maximumf>, %74, %cst_28 [1] : vector<8x8xf32> to vector<8xf32>
    %76 = vector.shape_cast %75 : vector<8xf32> to vector<8x1xf32>
    %77 = vector.broadcast %76 : vector<8x1xf32> to vector<8x8xf32>
    %78 = arith.subf %74, %77 : vector<8x8xf32>
    %79 = math.exp %78 : vector<8x8xf32>
    %cst_29 = arith.constant dense<0.000000e+00> : vector<8xf32>
    %80 = vector.multi_reduction <add>, %79, %cst_29 [1] : vector<8x8xf32> to vector<8xf32>
    %81 = vector.shape_cast %80 : vector<8xf32> to vector<8x1xf32>
    %82 = tpu.reciprocal %81 {approx = true} : vector<8x1xf32> -> vector<8x1xf32>
    %83 = vector.broadcast %82 : vector<8x1xf32> to vector<8x8xf32>
    %84 = arith.mulf %79, %83 : vector<8x8xf32>
    %cst_30 = arith.constant dense<0.000000e+00> : vector<8x8xf32>
    %85 = tpu.matmul %84, %71, %cst_30 {dimension_numbers = #tpu.dot_dimension_numbers<[1], [0], [0], [1], [0, 0, 1, 1], [], []>} : vector<8x8xf32>, vector<8x8xf32>, vector<8x8xf32> -> vector<8x8xf32>
    %86 = tpu.concatenate %68, %85 in 1 : vector<8x8xf32>, vector<8x8xf32> -> vector<8x16xf32>
    %87 = tpu.concatenate %51, %86 in 0 : vector<8x16xf32>, vector<8x16xf32> -> vector<16x16xf32>
    %c0_31 = arith.constant 0 : index
    %c96 = arith.constant 96 : index
    %c0_32 = arith.constant 0 : index
    %88 = vector.load %arg4[%c0_31, %c96, %c0_32] : memref<2x120x128xf32, #tpu.memory_space<vmem>>, vector<1x16x32xf32>
    %89 = vector.shape_cast %88 : vector<1x16x32xf32> to vector<16x32xf32>
    %cst_33 = arith.constant dense<0.000000e+00> : vector<16x32xf32>
    %90 = tpu.matmul %87, %89, %cst_33 {dimension_numbers = #tpu.dot_dimension_numbers<[1], [0], [0], [1], [0, 0, 1, 1], [], []>} : vector<16x16xf32>, vector<16x32xf32>, vector<16x32xf32> -> vector<16x32xf32>
    %91 = vector.extract_strided_slice %16 {offsets = [0, 0], sizes = [1, 32], strides = [1, 1]} : vector<8x128xf32> to vector<1x32xf32>
    %92 = vector.broadcast %91 : vector<1x32xf32> to vector<16x32xf32>
    %93 = arith.addf %90, %92 : vector<16x32xf32>
    %94 = arith.addf %93, %0 : vector<16x32xf32>
    %95 = vector.extract_strided_slice %16 {offsets = [1, 0], sizes = [1, 32], strides = [1, 1]} : vector<8x128xf32> to vector<1x32xf32>
    %96 = vector.extract_strided_slice %16 {offsets = [2, 0], sizes = [1, 32], strides = [1, 1]} : vector<8x128xf32> to vector<1x32xf32>
    %cst_34 = arith.constant dense<0.000000e+00> : vector<16xf32>
    %97 = vector.multi_reduction <add>, %94, %cst_34 [1] : vector<16x32xf32> to vector<16xf32>
    %98 = vector.shape_cast %97 : vector<16xf32> to vector<16x1xf32>
    %cst_35 = arith.constant 3.200000e+01 : f32
    %99 = vector.broadcast %cst_35 : f32 to vector<16x1xf32>
    %100 = arith.divf %98, %99 : vector<16x1xf32>
    %101 = vector.broadcast %100 : vector<16x1xf32> to vector<16x32xf32>
    %102 = arith.subf %94, %101 : vector<16x32xf32>
    %103 = arith.mulf %102, %102 : vector<16x32xf32>
    %cst_36 = arith.constant dense<0.000000e+00> : vector<16xf32>
    %104 = vector.multi_reduction <add>, %103, %cst_36 [1] : vector<16x32xf32> to vector<16xf32>
    %105 = vector.shape_cast %104 : vector<16xf32> to vector<16x1xf32>
    %cst_37 = arith.constant 3.200000e+01 : f32
    %106 = vector.broadcast %cst_37 : f32 to vector<16x1xf32>
    %107 = arith.divf %105, %106 : vector<16x1xf32>
    %108 = vector.broadcast %100 : vector<16x1xf32> to vector<16x32xf32>
    %109 = arith.subf %94, %108 : vector<16x32xf32>
    %cst_38 = arith.constant 9.99999974E-6 : f32
    %110 = vector.broadcast %cst_38 : f32 to vector<16x1xf32>
    %111 = arith.addf %107, %110 : vector<16x1xf32>
    %112 = math.rsqrt %111 : vector<16x1xf32>
    %113 = vector.broadcast %112 : vector<16x1xf32> to vector<16x32xf32>
    %114 = arith.mulf %109, %113 : vector<16x32xf32>
    %115 = vector.broadcast %95 : vector<1x32xf32> to vector<16x32xf32>
    %116 = arith.mulf %114, %115 : vector<16x32xf32>
    %117 = vector.broadcast %96 : vector<1x32xf32> to vector<16x32xf32>
    %118 = arith.addf %116, %117 : vector<16x32xf32>
    %c0_39 = arith.constant 0 : index
    %c0_40 = arith.constant 0 : index
    %c0_41 = arith.constant 0 : index
    %119 = vector.load %arg4[%c0_39, %c0_40, %c0_41] : memref<2x120x128xf32, #tpu.memory_space<vmem>>, vector<1x32x64xf32>
    %120 = vector.shape_cast %119 : vector<1x32x64xf32> to vector<32x64xf32>
    %c0_42 = arith.constant 0 : index
    %c32 = arith.constant 32 : index
    %c0_43 = arith.constant 0 : index
    %121 = vector.load %arg4[%c0_42, %c32, %c0_43] : memref<2x120x128xf32, #tpu.memory_space<vmem>>, vector<1x64x32xf32>
    %122 = vector.shape_cast %121 : vector<1x64x32xf32> to vector<64x32xf32>
    %cst_44 = arith.constant dense<0.000000e+00> : vector<16x64xf32>
    %123 = tpu.matmul %118, %120, %cst_44 {dimension_numbers = #tpu.dot_dimension_numbers<[1], [0], [0], [1], [0, 0, 1, 1], [], []>} : vector<16x32xf32>, vector<32x64xf32>, vector<16x64xf32> -> vector<16x64xf32>
    %124 = vector.extract_strided_slice %16 {offsets = [3, 0], sizes = [1, 64], strides = [1, 1]} : vector<8x128xf32> to vector<1x64xf32>
    %125 = vector.broadcast %124 : vector<1x64xf32> to vector<16x64xf32>
    %126 = arith.addf %123, %125 : vector<16x64xf32>
    %cst_45 = arith.constant 0.000000e+00 : f32
    %127 = vector.broadcast %cst_45 : f32 to vector<16x64xf32>
    %128 = arith.maximumf %126, %127 : vector<16x64xf32>
    %cst_46 = arith.constant dense<0.000000e+00> : vector<16x32xf32>
    %129 = tpu.matmul %128, %122, %cst_46 {dimension_numbers = #tpu.dot_dimension_numbers<[1], [0], [0], [1], [0, 0, 1, 1], [], []>} : vector<16x64xf32>, vector<64x32xf32>, vector<16x32xf32> -> vector<16x32xf32>
    %130 = vector.extract_strided_slice %16 {offsets = [4, 0], sizes = [1, 32], strides = [1, 1]} : vector<8x128xf32> to vector<1x32xf32>
    %131 = vector.broadcast %130 : vector<1x32xf32> to vector<16x32xf32>
    %132 = arith.addf %129, %131 : vector<16x32xf32>
    %133 = arith.addf %132, %118 : vector<16x32xf32>
    %134 = vector.extract_strided_slice %16 {offsets = [5, 0], sizes = [1, 32], strides = [1, 1]} : vector<8x128xf32> to vector<1x32xf32>
    %135 = vector.extract_strided_slice %16 {offsets = [6, 0], sizes = [1, 32], strides = [1, 1]} : vector<8x128xf32> to vector<1x32xf32>
    %cst_47 = arith.constant dense<0.000000e+00> : vector<16xf32>
    %136 = vector.multi_reduction <add>, %133, %cst_47 [1] : vector<16x32xf32> to vector<16xf32>
    %137 = vector.shape_cast %136 : vector<16xf32> to vector<16x1xf32>
    %cst_48 = arith.constant 3.200000e+01 : f32
    %138 = vector.broadcast %cst_48 : f32 to vector<16x1xf32>
    %139 = arith.divf %137, %138 : vector<16x1xf32>
    %140 = vector.broadcast %139 : vector<16x1xf32> to vector<16x32xf32>
    %141 = arith.subf %133, %140 : vector<16x32xf32>
    %142 = arith.mulf %141, %141 : vector<16x32xf32>
    %cst_49 = arith.constant dense<0.000000e+00> : vector<16xf32>
    %143 = vector.multi_reduction <add>, %142, %cst_49 [1] : vector<16x32xf32> to vector<16xf32>
    %144 = vector.shape_cast %143 : vector<16xf32> to vector<16x1xf32>
    %cst_50 = arith.constant 3.200000e+01 : f32
    %145 = vector.broadcast %cst_50 : f32 to vector<16x1xf32>
    %146 = arith.divf %144, %145 : vector<16x1xf32>
    %147 = vector.broadcast %139 : vector<16x1xf32> to vector<16x32xf32>
    %148 = arith.subf %133, %147 : vector<16x32xf32>
    %cst_51 = arith.constant 9.99999974E-6 : f32
    %149 = vector.broadcast %cst_51 : f32 to vector<16x1xf32>
    %150 = arith.addf %146, %149 : vector<16x1xf32>
    %151 = math.rsqrt %150 : vector<16x1xf32>
    %152 = vector.broadcast %151 : vector<16x1xf32> to vector<16x32xf32>
    %153 = arith.mulf %148, %152 : vector<16x32xf32>
    %154 = vector.broadcast %134 : vector<1x32xf32> to vector<16x32xf32>
    %155 = arith.mulf %153, %154 : vector<16x32xf32>
    %156 = vector.broadcast %135 : vector<1x32xf32> to vector<16x32xf32>
    %157 = arith.addf %155, %156 : vector<16x32xf32>
    %c0_52 = arith.constant 0 : index
    %c1_53 = arith.constant 1 : index
    %c0_54 = arith.constant 0 : index
    %158 = vector.load %arg2[%c0_52, %c1_53, %c0_54] : memref<2x2x128xf32, #tpu.memory_space<vmem>>, vector<1x1x128xf32>
    %159 = vector.shape_cast %158 : vector<1x1x128xf32> to vector<1x128xf32>
    %160 = vector.shape_cast %159 : vector<1x128xf32> to vector<1x128xf32>
    %161 = vector.broadcast %160 : vector<1x128xf32> to vector<8x128xf32>
    %c1_55 = arith.constant 1 : index
    %c1_56 = arith.constant 1 : index
    %c0_57 = arith.constant 0 : index
    %162 = vector.load %arg2[%c1_55, %c1_56, %c0_57] : memref<2x2x128xf32, #tpu.memory_space<vmem>>, vector<1x1x128xf32>
    %163 = vector.shape_cast %162 : vector<1x1x128xf32> to vector<1x128xf32>
    %164 = vector.shape_cast %163 : vector<1x128xf32> to vector<1x128xf32>
    %165 = vector.broadcast %164 : vector<1x128xf32> to vector<8x128xf32>
    %166 = tpu.concatenate %161, %165 in 0 : vector<8x128xf32>, vector<8x128xf32> -> vector<16x128xf32>
    %167 = tpu.concatenate %157, %157, %157, %157 in 1 : vector<16x32xf32>, vector<16x32xf32>, vector<16x32xf32>, vector<16x32xf32> -> vector<16x128xf32>
    %168 = arith.mulf %167, %166 : vector<16x128xf32>
    %c1_58 = arith.constant 1 : index
    %c0_59 = arith.constant 0 : index
    %c0_60 = arith.constant 0 : index
    %169 = vector.load %arg3[%c1_58, %c0_59, %c0_60] : memref<2x64x128xf32, #tpu.memory_space<vmem>>, vector<1x64x128xf32>
    %170 = vector.shape_cast %169 : vector<1x64x128xf32> to vector<64x128xf32>
    %cst_61 = arith.constant dense<0.000000e+00> : vector<16x64xf32>
    %171 = tpu.matmul %168, %170, %cst_61 {dimension_numbers = #tpu.dot_dimension_numbers<[1], [1], [0], [0], [0, 0, 1, 0], [], []>} : vector<16x128xf32>, vector<64x128xf32>, vector<16x64xf32> -> vector<16x64xf32>
    %c1_62 = arith.constant 1 : index
    %c112_63 = arith.constant 112 : index
    %c0_64 = arith.constant 0 : index
    %172 = vector.load %arg4[%c1_62, %c112_63, %c0_64] : memref<2x120x128xf32, #tpu.memory_space<vmem>>, vector<1x8x128xf32>
    %173 = vector.shape_cast %172 : vector<1x8x128xf32> to vector<8x128xf32>
    %174 = vector.extract_strided_slice %171 {offsets = [0, 0], sizes = [8, 8], strides = [1, 1]} : vector<16x64xf32> to vector<8x8xf32>
    %175 = vector.extract_strided_slice %171 {offsets = [0, 16], sizes = [8, 8], strides = [1, 1]} : vector<16x64xf32> to vector<8x8xf32>
    %176 = vector.extract_strided_slice %171 {offsets = [0, 32], sizes = [8, 8], strides = [1, 1]} : vector<16x64xf32> to vector<8x8xf32>
    %cst_65 = arith.constant dense<0.000000e+00> : vector<8x8xf32>
    %177 = tpu.matmul %174, %175, %cst_65 {dimension_numbers = #tpu.dot_dimension_numbers<[1], [1], [0], [0], [0, 0, 1, 0], [], []>} : vector<8x8xf32>, vector<8x8xf32>, vector<8x8xf32> -> vector<8x8xf32>
    %cst_66 = arith.constant 0.176776692 : f32
    %178 = vector.broadcast %cst_66 : f32 to vector<8x8xf32>
    %179 = arith.mulf %177, %178 : vector<8x8xf32>
    %cst_67 = arith.constant dense<0xFF800000> : vector<8xf32>
    %180 = vector.multi_reduction <maximumf>, %179, %cst_67 [1] : vector<8x8xf32> to vector<8xf32>
    %181 = vector.shape_cast %180 : vector<8xf32> to vector<8x1xf32>
    %182 = vector.broadcast %181 : vector<8x1xf32> to vector<8x8xf32>
    %183 = arith.subf %179, %182 : vector<8x8xf32>
    %184 = math.exp %183 : vector<8x8xf32>
    %cst_68 = arith.constant dense<0.000000e+00> : vector<8xf32>
    %185 = vector.multi_reduction <add>, %184, %cst_68 [1] : vector<8x8xf32> to vector<8xf32>
    %186 = vector.shape_cast %185 : vector<8xf32> to vector<8x1xf32>
    %187 = tpu.reciprocal %186 {approx = true} : vector<8x1xf32> -> vector<8x1xf32>
    %188 = vector.broadcast %187 : vector<8x1xf32> to vector<8x8xf32>
    %189 = arith.mulf %184, %188 : vector<8x8xf32>
    %cst_69 = arith.constant dense<0.000000e+00> : vector<8x8xf32>
    %190 = tpu.matmul %189, %176, %cst_69 {dimension_numbers = #tpu.dot_dimension_numbers<[1], [0], [0], [1], [0, 0, 1, 1], [], []>} : vector<8x8xf32>, vector<8x8xf32>, vector<8x8xf32> -> vector<8x8xf32>
    %191 = vector.extract_strided_slice %171 {offsets = [0, 8], sizes = [8, 8], strides = [1, 1]} : vector<16x64xf32> to vector<8x8xf32>
    %192 = vector.extract_strided_slice %171 {offsets = [0, 24], sizes = [8, 8], strides = [1, 1]} : vector<16x64xf32> to vector<8x8xf32>
    %193 = vector.extract_strided_slice %171 {offsets = [0, 40], sizes = [8, 8], strides = [1, 1]} : vector<16x64xf32> to vector<8x8xf32>
    %cst_70 = arith.constant dense<0.000000e+00> : vector<8x8xf32>
    %194 = tpu.matmul %191, %192, %cst_70 {dimension_numbers = #tpu.dot_dimension_numbers<[1], [1], [0], [0], [0, 0, 1, 0], [], []>} : vector<8x8xf32>, vector<8x8xf32>, vector<8x8xf32> -> vector<8x8xf32>
    %cst_71 = arith.constant 0.176776692 : f32
    %195 = vector.broadcast %cst_71 : f32 to vector<8x8xf32>
    %196 = arith.mulf %194, %195 : vector<8x8xf32>
    %cst_72 = arith.constant dense<0xFF800000> : vector<8xf32>
    %197 = vector.multi_reduction <maximumf>, %196, %cst_72 [1] : vector<8x8xf32> to vector<8xf32>
    %198 = vector.shape_cast %197 : vector<8xf32> to vector<8x1xf32>
    %199 = vector.broadcast %198 : vector<8x1xf32> to vector<8x8xf32>
    %200 = arith.subf %196, %199 : vector<8x8xf32>
    %201 = math.exp %200 : vector<8x8xf32>
    %cst_73 = arith.constant dense<0.000000e+00> : vector<8xf32>
    %202 = vector.multi_reduction <add>, %201, %cst_73 [1] : vector<8x8xf32> to vector<8xf32>
    %203 = vector.shape_cast %202 : vector<8xf32> to vector<8x1xf32>
    %204 = tpu.reciprocal %203 {approx = true} : vector<8x1xf32> -> vector<8x1xf32>
    %205 = vector.broadcast %204 : vector<8x1xf32> to vector<8x8xf32>
    %206 = arith.mulf %201, %205 : vector<8x8xf32>
    %cst_74 = arith.constant dense<0.000000e+00> : vector<8x8xf32>
    %207 = tpu.matmul %206, %193, %cst_74 {dimension_numbers = #tpu.dot_dimension_numbers<[1], [0], [0], [1], [0, 0, 1, 1], [], []>} : vector<8x8xf32>, vector<8x8xf32>, vector<8x8xf32> -> vector<8x8xf32>
    %208 = tpu.concatenate %190, %207 in 1 : vector<8x8xf32>, vector<8x8xf32> -> vector<8x16xf32>
    %209 = vector.extract_strided_slice %171 {offsets = [8, 0], sizes = [8, 8], strides = [1, 1]} : vector<16x64xf32> to vector<8x8xf32>
    %210 = vector.extract_strided_slice %171 {offsets = [8, 16], sizes = [8, 8], strides = [1, 1]} : vector<16x64xf32> to vector<8x8xf32>
    %211 = vector.extract_strided_slice %171 {offsets = [8, 32], sizes = [8, 8], strides = [1, 1]} : vector<16x64xf32> to vector<8x8xf32>
    %cst_75 = arith.constant dense<0.000000e+00> : vector<8x8xf32>
    %212 = tpu.matmul %209, %210, %cst_75 {dimension_numbers = #tpu.dot_dimension_numbers<[1], [1], [0], [0], [0, 0, 1, 0], [], []>} : vector<8x8xf32>, vector<8x8xf32>, vector<8x8xf32> -> vector<8x8xf32>
    %cst_76 = arith.constant 0.176776692 : f32
    %213 = vector.broadcast %cst_76 : f32 to vector<8x8xf32>
    %214 = arith.mulf %212, %213 : vector<8x8xf32>
    %cst_77 = arith.constant dense<0xFF800000> : vector<8xf32>
    %215 = vector.multi_reduction <maximumf>, %214, %cst_77 [1] : vector<8x8xf32> to vector<8xf32>
    %216 = vector.shape_cast %215 : vector<8xf32> to vector<8x1xf32>
    %217 = vector.broadcast %216 : vector<8x1xf32> to vector<8x8xf32>
    %218 = arith.subf %214, %217 : vector<8x8xf32>
    %219 = math.exp %218 : vector<8x8xf32>
    %cst_78 = arith.constant dense<0.000000e+00> : vector<8xf32>
    %220 = vector.multi_reduction <add>, %219, %cst_78 [1] : vector<8x8xf32> to vector<8xf32>
    %221 = vector.shape_cast %220 : vector<8xf32> to vector<8x1xf32>
    %222 = tpu.reciprocal %221 {approx = true} : vector<8x1xf32> -> vector<8x1xf32>
    %223 = vector.broadcast %222 : vector<8x1xf32> to vector<8x8xf32>
    %224 = arith.mulf %219, %223 : vector<8x8xf32>
    %cst_79 = arith.constant dense<0.000000e+00> : vector<8x8xf32>
    %225 = tpu.matmul %224, %211, %cst_79 {dimension_numbers = #tpu.dot_dimension_numbers<[1], [0], [0], [1], [0, 0, 1, 1], [], []>} : vector<8x8xf32>, vector<8x8xf32>, vector<8x8xf32> -> vector<8x8xf32>
    %226 = vector.extract_strided_slice %171 {offsets = [8, 8], sizes = [8, 8], strides = [1, 1]} : vector<16x64xf32> to vector<8x8xf32>
    %227 = vector.extract_strided_slice %171 {offsets = [8, 24], sizes = [8, 8], strides = [1, 1]} : vector<16x64xf32> to vector<8x8xf32>
    %228 = vector.extract_strided_slice %171 {offsets = [8, 40], sizes = [8, 8], strides = [1, 1]} : vector<16x64xf32> to vector<8x8xf32>
    %cst_80 = arith.constant dense<0.000000e+00> : vector<8x8xf32>
    %229 = tpu.matmul %226, %227, %cst_80 {dimension_numbers = #tpu.dot_dimension_numbers<[1], [1], [0], [0], [0, 0, 1, 0], [], []>} : vector<8x8xf32>, vector<8x8xf32>, vector<8x8xf32> -> vector<8x8xf32>
    %cst_81 = arith.constant 0.176776692 : f32
    %230 = vector.broadcast %cst_81 : f32 to vector<8x8xf32>
    %231 = arith.mulf %229, %230 : vector<8x8xf32>
    %cst_82 = arith.constant dense<0xFF800000> : vector<8xf32>
    %232 = vector.multi_reduction <maximumf>, %231, %cst_82 [1] : vector<8x8xf32> to vector<8xf32>
    %233 = vector.shape_cast %232 : vector<8xf32> to vector<8x1xf32>
    %234 = vector.broadcast %233 : vector<8x1xf32> to vector<8x8xf32>
    %235 = arith.subf %231, %234 : vector<8x8xf32>
    %236 = math.exp %235 : vector<8x8xf32>
    %cst_83 = arith.constant dense<0.000000e+00> : vector<8xf32>
    %237 = vector.multi_reduction <add>, %236, %cst_83 [1] : vector<8x8xf32> to vector<8xf32>
    %238 = vector.shape_cast %237 : vector<8xf32> to vector<8x1xf32>
    %239 = tpu.reciprocal %238 {approx = true} : vector<8x1xf32> -> vector<8x1xf32>
    %240 = vector.broadcast %239 : vector<8x1xf32> to vector<8x8xf32>
    %241 = arith.mulf %236, %240 : vector<8x8xf32>
    %cst_84 = arith.constant dense<0.000000e+00> : vector<8x8xf32>
    %242 = tpu.matmul %241, %228, %cst_84 {dimension_numbers = #tpu.dot_dimension_numbers<[1], [0], [0], [1], [0, 0, 1, 1], [], []>} : vector<8x8xf32>, vector<8x8xf32>, vector<8x8xf32> -> vector<8x8xf32>
    %243 = tpu.concatenate %225, %242 in 1 : vector<8x8xf32>, vector<8x8xf32> -> vector<8x16xf32>
    %244 = tpu.concatenate %208, %243 in 0 : vector<8x16xf32>, vector<8x16xf32> -> vector<16x16xf32>
    %c1_85 = arith.constant 1 : index
    %c96_86 = arith.constant 96 : index
    %c0_87 = arith.constant 0 : index
    %245 = vector.load %arg4[%c1_85, %c96_86, %c0_87] : memref<2x120x128xf32, #tpu.memory_space<vmem>>, vector<1x16x32xf32>
    %246 = vector.shape_cast %245 : vector<1x16x32xf32> to vector<16x32xf32>
    %cst_88 = arith.constant dense<0.000000e+00> : vector<16x32xf32>
    %247 = tpu.matmul %244, %246, %cst_88 {dimension_numbers = #tpu.dot_dimension_numbers<[1], [0], [0], [1], [0, 0, 1, 1], [], []>} : vector<16x16xf32>, vector<16x32xf32>, vector<16x32xf32> -> vector<16x32xf32>
    %248 = vector.extract_strided_slice %173 {offsets = [0, 0], sizes = [1, 32], strides = [1, 1]} : vector<8x128xf32> to vector<1x32xf32>
    %249 = vector.broadcast %248 : vector<1x32xf32> to vector<16x32xf32>
    %250 = arith.addf %247, %249 : vector<16x32xf32>
    %251 = arith.addf %250, %157 : vector<16x32xf32>
    %252 = vector.extract_strided_slice %173 {offsets = [1, 0], sizes = [1, 32], strides = [1, 1]} : vector<8x128xf32> to vector<1x32xf32>
    %253 = vector.extract_strided_slice %173 {offsets = [2, 0], sizes = [1, 32], strides = [1, 1]} : vector<8x128xf32> to vector<1x32xf32>
    %cst_89 = arith.constant dense<0.000000e+00> : vector<16xf32>
    %254 = vector.multi_reduction <add>, %251, %cst_89 [1] : vector<16x32xf32> to vector<16xf32>
    %255 = vector.shape_cast %254 : vector<16xf32> to vector<16x1xf32>
    %cst_90 = arith.constant 3.200000e+01 : f32
    %256 = vector.broadcast %cst_90 : f32 to vector<16x1xf32>
    %257 = arith.divf %255, %256 : vector<16x1xf32>
    %258 = vector.broadcast %257 : vector<16x1xf32> to vector<16x32xf32>
    %259 = arith.subf %251, %258 : vector<16x32xf32>
    %260 = arith.mulf %259, %259 : vector<16x32xf32>
    %cst_91 = arith.constant dense<0.000000e+00> : vector<16xf32>
    %261 = vector.multi_reduction <add>, %260, %cst_91 [1] : vector<16x32xf32> to vector<16xf32>
    %262 = vector.shape_cast %261 : vector<16xf32> to vector<16x1xf32>
    %cst_92 = arith.constant 3.200000e+01 : f32
    %263 = vector.broadcast %cst_92 : f32 to vector<16x1xf32>
    %264 = arith.divf %262, %263 : vector<16x1xf32>
    %265 = vector.broadcast %257 : vector<16x1xf32> to vector<16x32xf32>
    %266 = arith.subf %251, %265 : vector<16x32xf32>
    %cst_93 = arith.constant 9.99999974E-6 : f32
    %267 = vector.broadcast %cst_93 : f32 to vector<16x1xf32>
    %268 = arith.addf %264, %267 : vector<16x1xf32>
    %269 = math.rsqrt %268 : vector<16x1xf32>
    %270 = vector.broadcast %269 : vector<16x1xf32> to vector<16x32xf32>
    %271 = arith.mulf %266, %270 : vector<16x32xf32>
    %272 = vector.broadcast %252 : vector<1x32xf32> to vector<16x32xf32>
    %273 = arith.mulf %271, %272 : vector<16x32xf32>
    %274 = vector.broadcast %253 : vector<1x32xf32> to vector<16x32xf32>
    %275 = arith.addf %273, %274 : vector<16x32xf32>
    %c1_94 = arith.constant 1 : index
    %c0_95 = arith.constant 0 : index
    %c0_96 = arith.constant 0 : index
    %276 = vector.load %arg4[%c1_94, %c0_95, %c0_96] : memref<2x120x128xf32, #tpu.memory_space<vmem>>, vector<1x32x64xf32>
    %277 = vector.shape_cast %276 : vector<1x32x64xf32> to vector<32x64xf32>
    %c1_97 = arith.constant 1 : index
    %c32_98 = arith.constant 32 : index
    %c0_99 = arith.constant 0 : index
    %278 = vector.load %arg4[%c1_97, %c32_98, %c0_99] : memref<2x120x128xf32, #tpu.memory_space<vmem>>, vector<1x64x32xf32>
    %279 = vector.shape_cast %278 : vector<1x64x32xf32> to vector<64x32xf32>
    %cst_100 = arith.constant dense<0.000000e+00> : vector<16x64xf32>
    %280 = tpu.matmul %275, %277, %cst_100 {dimension_numbers = #tpu.dot_dimension_numbers<[1], [0], [0], [1], [0, 0, 1, 1], [], []>} : vector<16x32xf32>, vector<32x64xf32>, vector<16x64xf32> -> vector<16x64xf32>
    %281 = vector.extract_strided_slice %173 {offsets = [3, 0], sizes = [1, 64], strides = [1, 1]} : vector<8x128xf32> to vector<1x64xf32>
    %282 = vector.broadcast %281 : vector<1x64xf32> to vector<16x64xf32>
    %283 = arith.addf %280, %282 : vector<16x64xf32>
    %cst_101 = arith.constant 0.000000e+00 : f32
    %284 = vector.broadcast %cst_101 : f32 to vector<16x64xf32>
    %285 = arith.maximumf %283, %284 : vector<16x64xf32>
    %cst_102 = arith.constant dense<0.000000e+00> : vector<16x32xf32>
    %286 = tpu.matmul %285, %279, %cst_102 {dimension_numbers = #tpu.dot_dimension_numbers<[1], [0], [0], [1], [0, 0, 1, 1], [], []>} : vector<16x64xf32>, vector<64x32xf32>, vector<16x32xf32> -> vector<16x32xf32>
    %287 = vector.extract_strided_slice %173 {offsets = [4, 0], sizes = [1, 32], strides = [1, 1]} : vector<8x128xf32> to vector<1x32xf32>
    %288 = vector.broadcast %287 : vector<1x32xf32> to vector<16x32xf32>
    %289 = arith.addf %286, %288 : vector<16x32xf32>
    %290 = arith.addf %289, %275 : vector<16x32xf32>
    %291 = vector.extract_strided_slice %173 {offsets = [5, 0], sizes = [1, 32], strides = [1, 1]} : vector<8x128xf32> to vector<1x32xf32>
    %292 = vector.extract_strided_slice %173 {offsets = [6, 0], sizes = [1, 32], strides = [1, 1]} : vector<8x128xf32> to vector<1x32xf32>
    %cst_103 = arith.constant dense<0.000000e+00> : vector<16xf32>
    %293 = vector.multi_reduction <add>, %290, %cst_103 [1] : vector<16x32xf32> to vector<16xf32>
    %294 = vector.shape_cast %293 : vector<16xf32> to vector<16x1xf32>
    %cst_104 = arith.constant 3.200000e+01 : f32
    %295 = vector.broadcast %cst_104 : f32 to vector<16x1xf32>
    %296 = arith.divf %294, %295 : vector<16x1xf32>
    %297 = vector.broadcast %296 : vector<16x1xf32> to vector<16x32xf32>
    %298 = arith.subf %290, %297 : vector<16x32xf32>
    %299 = arith.mulf %298, %298 : vector<16x32xf32>
    %cst_105 = arith.constant dense<0.000000e+00> : vector<16xf32>
    %300 = vector.multi_reduction <add>, %299, %cst_105 [1] : vector<16x32xf32> to vector<16xf32>
    %301 = vector.shape_cast %300 : vector<16xf32> to vector<16x1xf32>
    %cst_106 = arith.constant 3.200000e+01 : f32
    %302 = vector.broadcast %cst_106 : f32 to vector<16x1xf32>
    %303 = arith.divf %301, %302 : vector<16x1xf32>
    %304 = vector.broadcast %296 : vector<16x1xf32> to vector<16x32xf32>
    %305 = arith.subf %290, %304 : vector<16x32xf32>
    %cst_107 = arith.constant 9.99999974E-6 : f32
    %306 = vector.broadcast %cst_107 : f32 to vector<16x1xf32>
    %307 = arith.addf %303, %306 : vector<16x1xf32>
    %308 = math.rsqrt %307 : vector<16x1xf32>
    %309 = vector.broadcast %308 : vector<16x1xf32> to vector<16x32xf32>
    %310 = arith.mulf %305, %309 : vector<16x32xf32>
    %311 = vector.broadcast %291 : vector<1x32xf32> to vector<16x32xf32>
    %312 = arith.mulf %310, %311 : vector<16x32xf32>
    %313 = vector.broadcast %292 : vector<1x32xf32> to vector<16x32xf32>
    %314 = arith.addf %312, %313 : vector<16x32xf32>
    %c0_108 = arith.constant 0 : index
    %c0_109 = arith.constant 0 : index
    %315 = vector.load %arg5[%c0_108, %c0_109] : memref<16x32xf32, #tpu.memory_space<vmem>>, vector<16x32xf32>
    tpu.vector_store %arg5[%c0_108, %c0_109], %314 {strides = array<i32>} : memref<16x32xf32, #tpu.memory_space<vmem>>, vector<16x32xf32>,
    return
  }
  func.func @transform_0(%arg0: i32) -> (i32, i32) {
    %c0_i32 = arith.constant 0 : i32
    %c0_i32_0 = arith.constant 0 : i32
    return %arg0, %c0_i32 : i32, i32
  }
  func.func @transform_1(%arg0: i32) -> (i32, i32, i32) {
    %c0_i32 = arith.constant 0 : i32
    %c0_i32_0 = arith.constant 0 : i32
    %c0_i32_1 = arith.constant 0 : i32
    return %arg0, %c0_i32, %c0_i32_0 : i32, i32, i32
  }
  func.func @transform_2(%arg0: i32) -> (i32, i32, i32) {
    %c0_i32 = arith.constant 0 : i32
    %c0_i32_0 = arith.constant 0 : i32
    %c0_i32_1 = arith.constant 0 : i32
    %c0_i32_2 = arith.constant 0 : i32
    return %c0_i32, %c0_i32_0, %c0_i32_1 : i32, i32, i32
  }
  func.func @transform_3(%arg0: i32) -> (i32, i32, i32) {
    %c0_i32 = arith.constant 0 : i32
    %c0_i32_0 = arith.constant 0 : i32
    %c0_i32_1 = arith.constant 0 : i32
    %c0_i32_2 = arith.constant 0 : i32
    return %c0_i32, %c0_i32_0, %c0_i32_1 : i32, i32, i32
  }
  func.func @transform_4(%arg0: i32) -> (i32, i32) {
    %c0_i32 = arith.constant 0 : i32
    %c0_i32_0 = arith.constant 0 : i32
    return %arg0, %c0_i32 : i32, i32
  }
}

</mosaic_0001>

<bundles_post_ra>
// kernel: tpu_custom_call.1
= control target key start
LH: loop header
LB: loop body
LE: loop exit
PB: predicated region body
PF: predicated region fallthrough
CT: control target
= control target key end

     0   :  { %9 = vsyncpa [#allocation3], 0  ;;  %s3385_s0 = inlined_call_operand.hbm [shape: f32[16,32], index: 0, kind: input, shape index: {}]   ;;  %s3386_s1 = inlined_call_operand.hbm [shape: f32[2,2,128], index: 1, kind: input, shape index: {}]   ;;  %s3387_s2 = inlined_call_operand.hbm [shape: f32[2,64,128], index: 2, kind: input, shape index: {}]   ;;  %s3388_s3 = inlined_call_operand.hbm [shape: f32[2,120,128], index: 3, kind: input, shape index: {}]   ;;  %s3389_s4 = inlined_call_operand.hbm [shape: f32[16,32], index: 4, kind: output, shape index: {}]  }
   0x1   :  { %10 = vsyncpa [#allocation6], 0 }
   0x2   :  { %11 = vsyncpa [#allocation9], 0 }
   0x3   :  { %12 = vsyncpa [#allocation4], 0  ;;  %s2990_s15 = smov [#allocation5]   ;;  %s2872_s19 = scalar_lea.hbm %s3386_s1, 64 }
   0x4   :  { %s30_s16 = sshll.u32 %s2990_s15, 4  ;;  %p2873_p0 = scmp.ne.s32.totalorder %s3386_s1, %s2872_s19  ;;  %s31_s16 = int_to_ptr.vmem [resolvable:$true] %s30_s16 }
   0x5   :  { %p2876_p1 = scmp.lt.u32.totalorder %s2872_s19, %s3386_s1 }
   0x7   :  { %p2878_p2 = pnand %p2876_p1, %p2873_p0 }
   0x9   :  { %2881 = shalt.err (!%p2878_p2)
}
   0xa   :  { %s2882_s24 = scalar_lea.vmem %s31_s16, 64  ;;  %p2887_p4 = scmp.lt.s32.totalorder %s31_s16, %s31_s16 }
   0xb   :  { %p2883_p3 = scmp.ne.s32.totalorder %s31_s16, %s2882_s24  ;;  %p2888_p5 = scmp.lt.s32.totalorder %s2882_s24, %s2882_s24 }
   0xd   :  { %p2889_p6 = por %p2888_p5, %p2887_p4 }
   0xf   :  { %p2890_p7 = pnand %p2889_p6, %p2883_p3 }
  0x11   :  { %2893 = shalt.err (!%p2890_p7)
}
  0x12   :  { %s2991_s25 = smov 32   ;;  %s2992_s26 = smov 2  }
  0x13   :  { %36 = dma.hbm_to_vmem [thread:$0]  %s3386_s1, 64, %s31_s16, [#allocation6], %s2991_s25, %s2991_s25, %s2992_s26  }
  0x14   :  { %s2993_s29 = smov [#allocation2]   ;;  %s2894_s7 = scalar_lea.hbm %s3385_s0, 256 }
  0x15   :  { %s18_s30 = sshll.u32 %s2993_s29, 4  ;;  %p2895_p8 = scmp.ne.s32.totalorder %s3385_s0, %s2894_s7  ;;  %s19_s30 = int_to_ptr.vmem [resolvable:$true] %s18_s30 }
  0x16   :  { %p2898_p9 = scmp.lt.u32.totalorder %s2894_s7, %s3385_s0 }
  0x18   :  { %p2900_p10 = pnand %p2898_p9, %p2895_p8 }
  0x1a   :  { %2903 = shalt.err (!%p2900_p10)
}
  0x1b   :  { %s2904_s12 = scalar_lea.vmem %s19_s30, 256  ;;  %p2909_p12 = scmp.lt.s32.totalorder %s19_s30, %s19_s30 }
  0x1c   :  { %p2905_p11 = scmp.ne.s32.totalorder %s19_s30, %s2904_s12  ;;  %p2910_p13 = scmp.lt.s32.totalorder %s2904_s12, %s2904_s12 }
  0x1e   :  { %p2911_p0 = por %p2910_p13, %p2909_p12 }
  0x20   :  { %p2912_p1 = pnand %p2911_p0, %p2905_p11 }
  0x22   :  { %2915 = shalt.err (!%p2912_p1)
}
  0x23   :  { %s2994_s1 = smov 128   ;;  %s2995_s13 = smov 8  }
  0x24   :  { %24 = dma.hbm_to_vmem [thread:$0]  %s3385_s0, 256, %s19_s30, [#allocation3], %s2994_s1, %s2994_s1, %s2995_s13  }
  0x25   :  { %s2996_s16 = smov [#allocation7]   ;;  %s2997_s18 = smov [#allocation8]  }
  0x26   :  { %s42_s17 = sshll.u32 %s2996_s16, 4  ;;  %s54_s19 = sshll.u32 %s2997_s18, 4  ;;  %s43_s17 = int_to_ptr.vmem [resolvable:$true] %s42_s17  ;;  %s3061_s19 = int_to_ptr.vmem [resolvable:$true] %s54_s19 }
  0x27   :  { %s2916_s22 = scalar_lea.hbm %s3387_s2, 2048 }
  0x28   :  { %p2917_p2 = scmp.ne.s32.totalorder %s3387_s2, %s2916_s22  ;;  %p2920_p3 = scmp.lt.u32.totalorder %s2916_s22, %s3387_s2 }
  0x2a   :  { %p2922_p4 = pnand %p2920_p3, %p2917_p2 }
  0x2c   :  { %2925 = shalt.err (!%p2922_p4)
}
  0x2d   :  { %s2926_s0 = scalar_lea.vmem %s43_s17, 2048  ;;  %p2931_p6 = scmp.lt.s32.totalorder %s43_s17, %s43_s17 }
  0x2e   :  { %p2927_p5 = scmp.ne.s32.totalorder %s43_s17, %s2926_s0  ;;  %p2932_p7 = scmp.lt.s32.totalorder %s2926_s0, %s2926_s0 }
  0x30   :  { %p2933_p8 = por %p2932_p7, %p2931_p6 }
  0x32   :  { %p2934_p9 = pnand %p2933_p8, %p2927_p5 }
  0x34   :  { %2937 = shalt.err (!%p2934_p9)
}
  0x35   :  { %48 = dma.hbm_to_vmem [thread:$0]  %s3387_s2, 2048, %s43_s17, [#allocation6], %s2994_s1, %s2994_s1, %s2995_s13  }
  0x36   :  { %s2938_s6 = scalar_lea.hbm %s3388_s3, 3840 }
  0x37   :  { %p2939_p10 = scmp.ne.s32.totalorder %s3388_s3, %s2938_s6  ;;  %p2942_p11 = scmp.lt.u32.totalorder %s2938_s6, %s3388_s3 }
  0x39   :  { %p2944_p12 = pnand %p2942_p11, %p2939_p10 }
  0x3b   :  { %2947 = shalt.err (!%p2944_p12)
}
  0x3c   :  { %s2948_s11 = scalar_lea.vmem %s3061_s19, 3840  ;;  %p2953_p0 = scmp.lt.s32.totalorder %s3061_s19, %s3061_s19 }
  0x3d   :  { %p2949_p13 = scmp.ne.s32.totalorder %s3061_s19, %s2948_s11  ;;  %p2954_p1 = scmp.lt.s32.totalorder %s2948_s11, %s2948_s11 }
  0x3f   :  { %p2955_p2 = por %p2954_p1, %p2953_p0 }
  0x41   :  { %p2956_p3 = pnand %p2955_p2, %p2949_p13 }
  0x43   :  { %2959 = shalt.err (!%p2956_p3)
}
  0x44   :  { %60 = dma.hbm_to_vmem [thread:$0]  %s3388_s3, 3840, %s3061_s19, [#allocation9], %s2994_s1, %s2994_s1, %s2995_s13  }
  0x45   :  { %2982 = dma.done.wait [#allocation3], 256  }
  0x46   :  { %2983 = vsyncadd [#allocation3], 4294967040 }
  0x47   :  { %2984 = dma.done.wait [#allocation6], 2112  }
  0x48   :  { %2985 = vsyncadd [#allocation6], 4294965184 }
  0x49   :  { %2986 = dma.done.wait [#allocation9], 3840  }
  0x4a   :  { %2987 = vsyncadd [#allocation9], 4294963456  ;;  %v3098_v0 = vld [vmem:[#allocation2] sm:$0xff]  ;;  %v117_v1 = vld [vmem:[#allocation7] sm:$0xff]  ;;  %s2998_s14 = smov 64   ;;  %s2999_s3 = smov 96  }
  0x4b   :  { %94 = vrot.lane.b32.xlu1 %v3098_v0, %s2998_s14  ;;  %88 = vrot.lane.b32.xlu0 %v3098_v0, %s2991_s25  ;;  %v118_v2 = vld [vmem:[#allocation7 + $0x8] sm:$0xff]  ;;  %v119_v3 = vld [vmem:[#allocation7 + $0x10] sm:$0xff]  ;;  %v120_v4 = vld [vmem:[#allocation7 + $0x18] sm:$0xff]  ;;  %vm106_vm0 = vcmask 261120   ;;  %vm109_vm1 = vcmask 523264   ;;  %vm112_vm2 = vcmask 785408  }
  0x4c   :  { %v3104_v5 = vld [vmem:[#allocation2 + $0x8] sm:$0xff]  ;;  %v2719_v6 = vpack.c.bf16 %v118_v2, %v117_v1  ;;  %v2723_v7 = vpack.c.bf16 %v120_v4, %v119_v3  ;;  %v121_v8 = vld [vmem:[#allocation7 + $0x20] sm:$0xff]  ;;  %v122_v9 = vld [vmem:[#allocation7 + $0x28] sm:$0xff]  ;;  %v3000_v30 = vmov 0.0   ;;  %vm3001_vm3 = vmmov 0   ;;  %s3002_s15 = smov 112  }
  0x4d   :  { %v2727_v10 = vpack.c.bf16 %v122_v9, %v121_v8  ;;  %v123_v11 = vld [vmem:[#allocation7 + $0x30] sm:$0xff]  ;;  %v124_v12 = vld [vmem:[#allocation7 + $0x38] sm:$0xff]  ;;  %2551 = vmatprep.subr.mxu1 %v3000_v30  ;;  %2553 = vmatprep.mubr.msk.f32.mxu1 %vm3001_vm3, %v3000_v30  ;;  %vm204_vm4 = vcmask 64512   ;;  %s3003_s16 = smov 104   ;;  %s3004_s17 = smov 120   ;;  %vm880_vm5 = vcmask 130048  }
  0x4e   :  { %2720 = vmatprep.subr.bf16.mxu0 %v2719_v6  ;;  %v2731_v13 = vpack.c.bf16 %v124_v12, %v123_v11  ;;  %v2396_v20 = vld [vmem:[#allocation5 + $0x2] ss:$0 sm:$0xff]  ;;  %v2395_v21 = vld [vmem:[#allocation5] ss:$0 sm:$0xff]  ;;  %s3005_s18 = smov 88  }
  0x4f   :  { %96 = vrot.lane.b32.xlu1 %v3104_v5, %s2998_s14  ;;  %90 = vrot.lane.b32.xlu0 %v3104_v5, %s2991_s25 }
  0x50   :  { %2722 = vmatpush3.bf16.xpose.msra.mxu0 %v2719_v6 }
  0x51   :  { %2724 = vmatprep.subr.bf16.mxu0 %v2723_v7 }
  0x53   :  { %102 = vrot.lane.b32.xlu1 %v3104_v5, %s2999_s3  ;;  %100 = vrot.lane.b32.xlu0 %v3098_v0, %s2999_s3 }
  0x58   :  { %2726 = vmatpush3.bf16.xpose.msra.mxu0 %v2723_v7 }
  0x59   :  { %2728 = vmatprep.subr.bf16.mxu0 %v2727_v10 }
  0x60   :  { %2730 = vmatpush3.bf16.xpose.msra.mxu0 %v2727_v10 }
  0x61   :  { %2732 = vmatprep.subr.bf16.mxu0 %v2731_v13 }
  0x68   :  { %2734 = vmatpush3.bf16.xpose.msra.mxu0 %v2731_v13 }
  0x69   :  { %2546 = vmatprep.subr.mxu0 %v3000_v30 }
  0xbd   :  { %v95_v14 = vpop.permute.xlu1 %94  ;;  %v89_v15 = vpop.permute.xlu0 %88 }
  0xbe   :  { %v107_v18 = vsel %vm106_vm0, %v3098_v0, %v89_v15 }
  0xbf   :  { %v110_v25 = vsel %vm109_vm1, %v107_v18, %v95_v14 }
  0xc1   :  { %v97_v16 = vpop.permute.xlu1 %96  ;;  %v91_v17 = vpop.permute.xlu0 %90 }
  0xc2   :  { %v108_v19 = vsel %vm106_vm0, %v3104_v5, %v91_v17 }
  0xc3   :  { %v111_v23 = vsel %vm109_vm1, %v108_v19, %v97_v16 }
  0xc5   :  { %v103_v22 = vpop.permute.xlu1 %102  ;;  %v101_v24 = vpop.permute.xlu0 %100 }
  0xc6   :  { %v114_v26 = vsel %vm112_vm2, %v111_v23, %v103_v22  ;;  %v113_v27 = vsel %vm112_vm2, %v110_v25, %v101_v24 }
  0xc7   :  { %v116_v28 = vmul.f32 %v2396_v20, %v114_v26  ;;  %v115_v29 = vmul.f32 %v2395_v21, %v113_v27 }
  0xc9   :  { %2543 = vmatprep.mubr.f32.mxu0 %v115_v29 }
  0xca   :  { %2544 = vmatmul.mubr.f32.vlgmr.msra.gmra.mrb[0].mxu0 %v116_v28 }
  0xcb   :  { %2548 = vmatprep.mubr.msk.f32.mxu0 %vm3001_vm3, %v3000_v30 }
 0x19d   :  { %v3128_v31 = vpop.f32.mrb[0].mxu0 }
 0x19e   :  { %v191_v32 = vpop.f32.mrb[1].mxu0 }
 0x19f   :  { %202 = vrot.lane.b32.xlu0 %v191_v32, %s3002_s15 }
 0x211   :  { %v203_v33 = vpop.permute.xlu0 %202 }
 0x212   :  { %2547 = vmatpush3.xpose.msk.msra.mxu0 %vm204_vm4, %v203_v33 }
 0x215   :  { %2549 = vmatmul.mubr.msk.f32.vlgmr.msra.gmra.mrb[2].mxu0 %vm204_vm4, %v191_v32 }
 0x2e8   :  { %v275_v34 = vpop.f32.mrb[2].mxu0 }
 0x2e9   :  { %v279_v35 = vmul.f32 0.17677669, %v275_v34  ;;  %v2550_v36 = vpop.f32.mrb[3].mxu0 }
 0x2eb   :  { %v280_v37 = vsel %vm204_vm4, %v279_v35, -inf }
 0x2ec   :  { %281 = vmax.xlane.f32.xlu1 %v280_v37 }
 0x2fd   :  { %369 = vrot.lane.b32.xlu1 %v191_v32, %s3003_s16 }
 0x301   :  { %367 = vrot.lane.b32.xlu1 %v191_v32, %s3004_s17 }
 0x379   :  { %v282_v38 = vpop.xlane.xlu1 %281 }
 0x37a   :  { %v283_v39 = vsub.f32 %v279_v35, %v282_v38 }
 0x37c   :  { %v284_v40 = vmul.f32 1.442695, %v283_v39  ;;  %v874_v39 = vld [vmem:[#allocation8 + $0x60] sm:$0xff] }
 0x37d   :  { %v370_v46 = vpop.permute.xlu1 %369 }
 0x37e   :  { %2824 = vpow2.f32 %v284_v40  ;;  %v875_v40 = vld [vmem:[#allocation8 + $0x68] sm:$0xff] }
 0x381   :  { %v368_v48 = vpop.permute.xlu1 %367 }
 0x388   :  { %v2825_v41 = vpop.eup %2824 }
 0x389   :  { %v286_v42 = vsel %vm204_vm4, %v2825_v41, 0.0 }
 0x38a   :  { %287 = vadd.xlane.f32.xlu0 %v286_v42 }
 0x3a0   :  { %291 = vrot.lane.b32.xlu0 %v191_v32, %s2999_s3 }
 0x417   :  { %v288_v43 = vpop.xlane.xlu0 %287 }
 0x418   :  { %2826 = vrcp.f32 %v288_v43 }
 0x41b   :  { %v292_v44 = vpop.permute.xlu0 %291 }
 0x41c   :  { %2552 = vmatpush3.msra.mxu1 %v292_v44 }
 0x41d   :  { %2556 = vmatprep.subr.mxu1 %v3000_v30 }
 0x422   :  { %v2827_v45 = vpop.eup %2826 }
 0x423   :  { %v290_v47 = vmul.f32 %v2827_v45, %v2825_v41  ;;  %v2735_v41 = vpack.c.bf16 %v875_v40, %v874_v39  ;;  %v876_v45 = vlaneseq  ;;  %v1013_v39 = vld [vmem:[#allocation8 + $0x50] sm:$0xff]  ;;  %v1014_v40 = vld [vmem:[#allocation8 + $0x58] sm:$0xff] }
 0x425   :  { %2554 = vmatmul.mubr.msk.f32.vlgmr.msra.gmra.mrb[0].mxu1 %vm204_vm4, %v290_v47  ;;  %2736 = vmatprep.subr.bf16.mxu0 %v2735_v41 }
 0x426   :  { %2557 = vmatpush3.xpose.msk.msra.mxu1 %vm204_vm4, %v370_v46  ;;  %2558 = vmatprep.mubr.msk.f32.mxu1 %vm3001_vm3, %v3000_v30  ;;  %v3193_v46 = vshrl.u32 %v876_v45, 7 }
 0x427   :  { %2561 = vmatprep.subr.mxu1 %v3000_v30  ;;  %2738 = vmatpush3.bf16.msra.mxu0 %v2735_v41  ;;  %v2759_v41 = vpack.c.bf16 %v1014_v40, %v1013_v39 }
 0x428   :  { %v878_v47 = vsub.s32 0, %v3193_v46 }
 0x429   :  { %2559 = vmatmul.mubr.msk.f32.vlgmr.msra.gmra.mrb[2].mxu1 %vm204_vm4, %v368_v48  ;;  %v3196_v48 = vld [vmem:[#allocation8 + $0x70] sm:$0xff] }
 0x42a   :  { %2563 = vmatprep.mubr.msk.f32.mxu1 %vm3001_vm3, %v3000_v30 }
 0x4f8   :  { %v3147_v49 = vpop.f32.mrb[0].mxu1 }
 0x4f9   :  { %v2555_v50 = vpop.f32.mrb[1].mxu1 }
 0x4fc   :  { %v441_v51 = vpop.f32.mrb[2].mxu1 }
 0x4fd   :  { %v445_v52 = vmul.f32 0.17677669, %v441_v51  ;;  %v2560_v53 = vpop.f32.mrb[3].mxu1 }
 0x4ff   :  { %v446_v54 = vsel %vm204_vm4, %v445_v52, -inf }
 0x500   :  { %447 = vmax.xlane.f32.xlu0 %v446_v54 }
 0x516   :  { %457 = vrot.lane.b32.xlu0 %v191_v32, %s3005_s18 }
 0x58d   :  { %v448_v55 = vpop.xlane.xlu0 %447 }
 0x58e   :  { %v449_v56 = vsub.f32 %v445_v52, %v448_v55 }
 0x590   :  { %v450_v57 = vmul.f32 1.442695, %v449_v56 }
 0x591   :  { %v458_v58 = vpop.permute.xlu0 %457 }
 0x592   :  { %2828 = vpow2.f32 %v450_v57  ;;  %2562 = vmatpush3.msra.mxu1 %v458_v58 }
 0x593   :  { %2566 = vmatprep.subr.mxu1 %v3000_v30 }
 0x59c   :  { %v2829_v59 = vpop.eup %2828 }
 0x59d   :  { %v452_v60 = vsel %vm204_vm4, %v2829_v59, 0.0 }
 0x59e   :  { %453 = vadd.xlane.f32.xlu1 %v452_v60 }
 0x5af   :  { %539 = vrot.lane.b32.xlu1 %v3128_v31, %s3002_s15 }
 0x62b   :  { %v454_v61 = vpop.xlane.xlu1 %453 }
 0x62c   :  { %2830 = vrcp.f32 %v454_v61 }
 0x62f   :  { %v540_v1 = vpop.permute.xlu1 %539 }
 0x636   :  { %v2831_v62 = vpop.eup %2830 }
 0x637   :  { %v456_v63 = vmul.f32 %v2831_v62, %v2829_v59 }
 0x639   :  { %2564 = vmatmul.mubr.msk.f32.vlgmr.msra.gmra.mrb[4].mxu1 %vm204_vm4, %v456_v63 }
 0x63a   :  { %2567 = vmatpush3.xpose.msk.msra.mxu1 %vm204_vm4, %v540_v1  ;;  %2568 = vmatprep.mubr.msk.f32.mxu1 %vm3001_vm3, %v3000_v30 }
 0x63b   :  { %2571 = vmatprep.subr.mxu1 %v3000_v30 }
 0x63d   :  { %2569 = vmatmul.mubr.msk.f32.vlgmr.msra.gmra.mrb[6].mxu1 %vm204_vm4, %v3128_v31 }
 0x63e   :  { %2573 = vmatprep.mubr.msk.f32.mxu1 %vm3001_vm3, %v3000_v30 }
 0x70c   :  { %v529_v2 = vpop.f32.mrb[4].mxu1 }
 0x70d   :  { %v2565_v3 = vpop.f32.mrb[5].mxu1 }
 0x710   :  { %v611_v4 = vpop.f32.mrb[6].mxu1 }
 0x711   :  { %v615_v6 = vmul.f32 0.17677669, %v611_v4  ;;  %v2570_v7 = vpop.f32.mrb[7].mxu1  ;;  %v1004_v4 = vld [vmem:[#allocation8 + $0x8] sm:$0xff] }
 0x712   :  { %v1005_v7 = vld [vmem:[#allocation8 + $0x10] sm:$0xff] }
 0x713   :  { %v616_v8 = vsel %vm204_vm4, %v615_v6, -inf }
 0x714   :  { %617 = vmax.xlane.f32.xlu0 %v616_v8  ;;  %v1006_v8 = vld [vmem:[#allocation8 + $0x18] sm:$0xff] }
 0x72a   :  { %627 = vrot.lane.b32.xlu0 %v3128_v31, %s2999_s3 }
 0x72e   :  { %703 = vrot.lane.b32.xlu0 %v3128_v31, %s3004_s17 }
 0x7a1   :  { %v618_v9 = vpop.xlane.xlu0 %617 }
 0x7a2   :  { %v619_v10 = vsub.f32 %v615_v6, %v618_v9  ;;  %v2743_v9 = vpack.c.bf16 %v1006_v8, %v1005_v7  ;;  %v1266_v8 = vld [vmem:[#allocation7 + $0x40] sm:$0xff] }
 0x7a4   :  { %v620_v11 = vmul.f32 1.442695, %v619_v10  ;;  %v1007_v10 = vld [vmem:[#allocation8 + $0x20] sm:$0xff] }
 0x7a5   :  { %v628_v12 = vpop.permute.xlu0 %627 }
 0x7a6   :  { %2832 = vpow2.f32 %v620_v11  ;;  %2572 = vmatpush3.msra.mxu1 %v628_v12  ;;  %v1008_v11 = vld [vmem:[#allocation8 + $0x28] sm:$0xff]  ;;  %v1009_v12 = vld [vmem:[#allocation8 + $0x30] sm:$0xff] }
 0x7a7   :  { %2576 = vmatprep.subr.mxu1 %v3000_v30 }
 0x7a9   :  { %v704_v19 = vpop.permute.xlu0 %703 }
 0x7b0   :  { %v2833_v13 = vpop.eup %2832 }
 0x7b1   :  { %v622_v14 = vsel %vm204_vm4, %v2833_v13, 0.0 }
 0x7b2   :  { %623 = vadd.xlane.f32.xlu1 %v622_v14  ;;  %v1010_v14 = vld [vmem:[#allocation8 + $0x38] sm:$0xff] }
 0x7c3   :  { %705 = vrot.lane.b32.xlu1 %v3128_v31, %s3003_s16 }
 0x83f   :  { %v624_v15 = vpop.xlane.xlu1 %623 }
 0x840   :  { %2834 = vrcp.f32 %v624_v15  ;;  %v2751_v15 = vpack.c.bf16 %v1010_v14, %v1009_v12  ;;  %v1269_v12 = vld [vmem:[#allocation7 + $0x58] sm:$0xff]  ;;  %v1270_v14 = vld [vmem:[#allocation7 + $0x60] sm:$0xff] }
 0x843   :  { %v706_v18 = vpop.permute.xlu1 %705 }
 0x84a   :  { %v2835_v16 = vpop.eup %2834 }
 0x84b   :  { %v626_v17 = vmul.f32 %v2835_v16, %v2833_v13  ;;  %v2747_v13 = vpack.c.bf16 %v1008_v11, %v1007_v10  ;;  %v1011_v16 = vld [vmem:[#allocation8 + $0x40] sm:$0xff]  ;;  %v1268_v10 = vld [vmem:[#allocation7 + $0x50] sm:$0xff] }
 0x84d   :  { %2574 = vmatmul.mubr.msk.f32.vlgmr.msra.gmra.mrb[8].mxu1 %vm204_vm4, %v626_v17  ;;  %v1012_v17 = vld [vmem:[#allocation8 + $0x48] sm:$0xff]  ;;  %2748 = vmatprep.subr.bf16.mxu0 %v2747_v13 }
 0x84e   :  { %2577 = vmatpush3.xpose.msk.msra.mxu1 %vm204_vm4, %v706_v18  ;;  %2578 = vmatprep.mubr.msk.f32.mxu1 %vm3001_vm3, %v3000_v30  ;;  %v2755_v18 = vpack.c.bf16 %v1012_v17, %v1011_v16 }
 0x84f   :  { %2581 = vmatprep.subr.mxu1 %v3000_v30 }
 0x851   :  { %2579 = vmatmul.mubr.msk.f32.vlgmr.msra.gmra.mrb[10].mxu1 %vm204_vm4, %v704_v19 }
 0x852   :  { %2583 = vmatprep.mubr.msk.f32.mxu1 %vm3001_vm3, %v3000_v30 }
 0x920   :  { %v699_v20 = vpop.f32.mrb[8].mxu1 }
 0x921   :  { %v2575_v21 = vpop.f32.mrb[9].mxu1 }
 0x924   :  { %v777_v22 = vpop.f32.mrb[10].mxu1 }
 0x925   :  { %v781_v23 = vmul.f32 0.17677669, %v777_v22  ;;  %v2580_v24 = vpop.f32.mrb[11].mxu1 }
 0x927   :  { %v782_v25 = vsel %vm204_vm4, %v781_v23, -inf }
 0x928   :  { %783 = vmax.xlane.f32.xlu1 %v782_v25  ;;  %v993_v25 = vsub.s32 1, %v3193_v46 }
 0x939   :  { %534 = vrot.lane.b32.xlu1 %v529_v2, %s2995_s13 }
 0x9b5   :  { %v784_v26 = vpop.xlane.xlu1 %783 }
 0x9b6   :  { %v785_v27 = vsub.f32 %v781_v23, %v784_v26  ;;  %v999_v26 = vsub.s32 2, %v3193_v46 }
 0x9b8   :  { %v786_v28 = vmul.f32 1.442695, %v785_v27  ;;  %v994_v27 = vrot.slane %v3196_v48, %v993_v25 }
 0x9b9   :  { %v535_v29 = vpop.permute.xlu1 %534 }
 0x9ba   :  { %2836 = vpow2.f32 %v786_v28  ;;  %v537_v32 = vsel %vm204_vm4, %v3147_v49, %v535_v29  ;;  %v879_v49 = vrot.slane %v3196_v48, %v878_v47 }
 0x9bb   :  { %2590 = vmatprep.mubr.msk.f32.mxu0 %vm880_vm5, %v537_v32  ;;  %v1000_v32 = vrot.slane %v3196_v48, %v999_v26 }
 0x9c4   :  { %v2837_v33 = vpop.eup %2836 }
 0x9c5   :  { %v788_v34 = vsel %vm204_vm4, %v2837_v33, 0.0 }
 0x9c6   :  { %789 = vadd.xlane.f32.xlu0 %v788_v34 }
 0x9dc   :  { %793 = vrot.lane.b32.xlu0 %v3128_v31, %s3005_s18 }
 0xa53   :  { %v790_v35 = vpop.xlane.xlu0 %789 }
 0xa54   :  { %2838 = vrcp.f32 %v790_v35 }
 0xa57   :  { %v794_v36 = vpop.permute.xlu0 %793 }
 0xa58   :  { %2582 = vmatpush3.msra.mxu1 %v794_v36 }
 0xa5e   :  { %v2839_v37 = vpop.eup %2838 }
 0xa5f   :  { %v792_v38 = vmul.f32 %v2839_v37, %v2837_v33 }
 0xa61   :  { %2584 = vmatmul.mubr.msk.f32.vlgmr.msra.gmra.mrb[12].mxu1 %vm204_vm4, %v792_v38 }
 0xb34   :  { %v865_v42 = vpop.f32.mrb[12].mxu1 }
 0xb35   :  { %870 = vrot.lane.b32.xlu1 %v865_v42, %s2995_s13  ;;  %v2585_v43 = vpop.f32.mrb[13].mxu1  ;;  %v1017_v42 = vsub.s32 3, %v3193_v46 }
 0xb37   :  { %v1018_v43 = vrot.slane %v3196_v48, %v1017_v42 }
 0xba7   :  { %v871_v44 = vpop.permute.xlu1 %870 }
 0xba8   :  { %v873_v31 = vsel %vm204_vm4, %v699_v20, %v871_v44 }
 0xba9   :  { %2591 = vmatmul.mubr.msk.f32.vlgmr.msra.gmra.mrb[4].mxu0 %vm880_vm5, %v873_v31 }
 0xbaa   :  { %2750 = vmatpush3.bf16.msra.mxu0 %v2747_v13  ;;  %v2767_v13 = vpack.c.bf16 %v1269_v12, %v1268_v10 }
 0xbab   :  { %2752 = vmatprep.subr.bf16.mxu0 %v2751_v15 }
 0xbae   :  { %2754 = vmatpush3.bf16.msra.mxu0 %v2751_v15  ;;  %v1271_v15 = vld [vmem:[#allocation7 + $0x68] sm:$0xff] }
 0xbaf   :  { %2756 = vmatprep.subr.bf16.mxu0 %v2755_v18  ;;  %v2771_v16 = vpack.c.bf16 %v1271_v15, %v1270_v14 }
 0xbb2   :  { %2758 = vmatpush3.bf16.msra.mxu0 %v2755_v18 }
 0xbb3   :  { %2760 = vmatprep.subr.bf16.mxu0 %v2759_v41 }
 0xbb6   :  { %2762 = vmatpush3.bf16.msra.mxu0 %v2759_v41 }
 0xbb7   :  { %2642 = vmatprep.subr.mxu0 %v3000_v30 }
 0xc7c   :  { %v2592_v50 = vpop.f32.mrb[4].mxu0 }
 0xc7d   :  { %v959_v51 = vadd.f32 %v2592_v50, %v879_v49  ;;  %v953_v52 = vpop.f32.mrb[5].mxu0 }
 0xc7e   :  { %v954_v53 = vadd.f32 %v953_v52, %v879_v49  ;;  %v1104_v52 = vsub.s32 4, %v3193_v46 }
 0xc7f   :  { %v963_v54 = vadd.f32 %v959_v51, %v3104_v5 }
 0xc80   :  { %v962_v55 = vadd.f32 %v954_v53, %v3098_v0  ;;  %v1003_v0 = vld [vmem:[#allocation8] sm:$0xff]  ;;  %v1105_v53 = vrot.slane %v3196_v48, %v1104_v52 }
 0xc81   :  { %v967_v56 = vsel %vm106_vm0, %v963_v54, 0.0  ;;  %v2739_v6 = vpack.c.bf16 %v1004_v4, %v1003_v0 }
 0xc82   :  { %968 = vadd.xlane.f32.xlu1 %v967_v56  ;;  %v964_v57 = vsel %vm106_vm0, %v962_v55, 0.0 }
 0xc83   :  { %965 = vadd.xlane.f32.xlu0 %v964_v57  ;;  %2740 = vmatprep.subr.bf16.mxu1 %v2739_v6 }
 0xc84   :  { %2742 = vmatpush3.bf16.msra.mxu1 %v2739_v6 }
 0xc85   :  { %2744 = vmatprep.subr.bf16.mxu1 %v2743_v9 }
 0xc88   :  { %2746 = vmatpush3.bf16.msra.mxu1 %v2743_v9  ;;  %v1267_v9 = vld [vmem:[#allocation7 + $0x48] sm:$0xff] }
 0xc89   :  { %v2763_v11 = vpack.c.bf16 %v1267_v9, %v1266_v8 }
 0xc8b   :  { %2764 = vmatprep.subr.bf16.mxu1 %v2763_v11 }
 0xd0f   :  { %v969_v58 = vpop.xlane.xlu1 %968 }
 0xd10   :  { %v972_v59 = vmul.f32 0.03125, %v969_v58  ;;  %v966_v60 = vpop.xlane.xlu0 %965 }
 0xd11   :  { %v971_v61 = vmul.f32 0.03125, %v966_v60 }
 0xd12   :  { %v974_v62 = vsub.f32 %v963_v54, %v972_v59 }
 0xd13   :  { %v973_v63 = vsub.f32 %v962_v55, %v971_v61 }
 0xd14   :  { %v976_v3 = vmul.f32 %v974_v62, %v974_v62 }
 0xd15   :  { %v975_v1 = vmul.f32 %v973_v63, %v973_v63 }
 0xd16   :  { %v980_v5 = vsel %vm106_vm0, %v976_v3, 0.0 }
 0xd17   :  { %v977_v2 = vsel %vm106_vm0, %v975_v1, 0.0 }
 0xd18   :  { %978 = vadd.xlane.f32.xlu0 %v977_v2 }
 0xd1c   :  { %981 = vadd.xlane.f32.xlu0 %v980_v5 }
 0xda5   :  { %v979_v19 = vpop.xlane.xlu0 %978 }
 0xda6   :  { %v983_v20 = vmul.f32 0.03125, %v979_v19 }
 0xda8   :  { %v985_v21 = vadd.f32 1e-05, %v983_v20 }
 0xda9   :  { %v982_v22 = vpop.xlane.xlu0 %981 }
 0xdaa   :  { %2840 = vrsqrt.f32 %v985_v21  ;;  %v984_v23 = vmul.f32 0.03125, %v982_v22 }
 0xdac   :  { %v986_v24 = vadd.f32 1e-05, %v984_v23  ;;  %v1217_v23 = vsub.s32 5, %v3193_v46 }
 0xdae   :  { %2842 = vrsqrt.f32 %v986_v24  ;;  %v1223_v24 = vsub.s32 6, %v3193_v46 }
 0xdb4   :  { %v2841_v28 = vpop.eup %2840 }
 0xdb5   :  { %v989_v29 = vmul.f32 %v2841_v28, %v973_v63  ;;  %v1273_v28 = vld [vmem:[#allocation7 + $0x78] sm:$0xff] }
 0xdb7   :  { %v995_v33 = vmul.f32 %v994_v27, %v989_v29  ;;  %v1218_v29 = vrot.slane %v3196_v48, %v1217_v23 }
 0xdb8   :  { %v2843_v34 = vpop.eup %2842 }
 0xdb9   :  { %v990_v35 = vmul.f32 %v2843_v34, %v974_v62  ;;  %v1001_v36 = vadd.f32 %v1000_v32, %v995_v33 }
 0xdbb   :  { %v996_v37 = vmul.f32 %v994_v27, %v990_v35  ;;  %2601 = vmatprep.mubr.msk.f32.mxu1 %vm106_vm0, %v1001_v36  ;;  %v1272_v27 = vld [vmem:[#allocation7 + $0x70] sm:$0xff] }
 0xdbd   :  { %v1002_v38 = vadd.f32 %v1000_v32, %v996_v37  ;;  %v2775_v32 = vpack.c.bf16 %v1273_v28, %v1272_v27 }
 0xdbf   :  { %2602 = vmatmul.mubr.msk.f32.vlgmr.msra.gmra.mrb[14].mxu1 %vm106_vm0, %v1002_v38 }
 0xdc0   :  { %2766 = vmatpush3.bf16.xpose.msra.mxu1 %v2763_v11 }
 0xdc1   :  { %2768 = vmatprep.subr.bf16.mxu1 %v2767_v13 }
 0xdc8   :  { %2770 = vmatpush3.bf16.xpose.msra.mxu1 %v2767_v13 }
 0xdc9   :  { %2772 = vmatprep.subr.bf16.mxu1 %v2771_v16 }
 0xdd0   :  { %2774 = vmatpush3.bf16.xpose.msra.mxu1 %v2771_v16 }
 0xdd1   :  { %2776 = vmatprep.subr.bf16.mxu1 %v2775_v32 }
 0xdd8   :  { %2778 = vmatpush3.bf16.xpose.msra.mxu1 %v2775_v32 }
 0xdd9   :  { %2672 = vmatprep.subr.mxu1 %v3000_v30 }
 0xe92   :  { %v2603_v44 = vpop.f32.mrb[14].mxu1 }
 0xe93   :  { %v1097_v31 = vadd.f32 %v2603_v44, %v1018_v43  ;;  %v1091_v45 = vpop.f32.mrb[15].mxu1 }
 0xe94   :  { %v1092_v49 = vadd.f32 %v1091_v45, %v1018_v43 }
 0xe95   :  { %v1101_v51 = vmax.f32 %v1097_v31, 0.0 }
 0xe96   :  { %v1100_v50 = vmax.f32 %v1092_v49, 0.0  ;;  %v2415_v49 = vld [vmem:[#allocation5 + $0x1] ss:$0 sm:$0xff] }
 0xe98   :  { %2620 = vmatprep.mubr.msk.f32.mxu0 %vm109_vm1, %v1100_v50 }
 0xe99   :  { %2621 = vmatmul.mubr.msk.f32.vlgmr.msra.gmra.mrb[6].mxu0 %vm109_vm1, %v1101_v51 }
 0xe9a   :  { %2644 = vmatprep.mubr.msk.f32.mxu0 %vm3001_vm3, %v3000_v30 }
 0xf6c   :  { %v2622_v54 = vpop.f32.mrb[6].mxu0 }
 0xf6d   :  { %v1184_v55 = vadd.f32 %v2622_v54, %v1105_v53  ;;  %v1178_v56 = vpop.f32.mrb[7].mxu0 }
 0xf6e   :  { %v1179_v57 = vadd.f32 %v1178_v56, %v1105_v53 }
 0xf6f   :  { %v1188_v58 = vadd.f32 %v1184_v55, %v1002_v38  ;;  %v2416_v55 = vld [vmem:[#allocation5 + $0x3] ss:$0 sm:$0xff] }
 0xf70   :  { %v1187_v59 = vadd.f32 %v1179_v57, %v1001_v36  ;;  %v1224_v36 = vrot.slane %v3196_v48, %v1223_v24 }
 0xf71   :  { %v1192_v60 = vsel %vm106_vm0, %v1188_v58, 0.0 }
 0xf72   :  { %1193 = vadd.xlane.f32.xlu0 %v1192_v60  ;;  %v1189_v61 = vsel %vm106_vm0, %v1187_v59, 0.0 }
 0xf73   :  { %1190 = vadd.xlane.f32.xlu1 %v1189_v61 }
 0xfff   :  { %v1194_v62 = vpop.xlane.xlu0 %1193 }
0x1000   :  { %v1196_v63 = vmul.f32 0.03125, %v1194_v62  ;;  %v1191_v1 = vpop.xlane.xlu1 %1190 }
0x1001   :  { %v1195_v2 = vmul.f32 0.03125, %v1191_v1 }
0x1002   :  { %v1198_v3 = vsub.f32 %v1188_v58, %v1196_v63 }
0x1003   :  { %v1197_v5 = vsub.f32 %v1187_v59, %v1195_v2 }
0x1004   :  { %v1200_v0 = vmul.f32 %v1198_v3, %v1198_v3 }
0x1005   :  { %v1199_v4 = vmul.f32 %v1197_v5, %v1197_v5 }
0x1006   :  { %v1204_v6 = vsel %vm106_vm0, %v1200_v0, 0.0 }
0x1007   :  { %1205 = vadd.xlane.f32.xlu0 %v1204_v6  ;;  %v1201_v7 = vsel %vm106_vm0, %v1199_v4, 0.0 }
0x1008   :  { %1202 = vadd.xlane.f32.xlu1 %v1201_v7 }
0x1094   :  { %v1206_v17 = vpop.xlane.xlu0 %1205 }
0x1095   :  { %v1208_v18 = vmul.f32 0.03125, %v1206_v17  ;;  %v1203_v19 = vpop.xlane.xlu1 %1202 }
0x1096   :  { %v1207_v20 = vmul.f32 0.03125, %v1203_v19 }
0x1097   :  { %v1210_v21 = vadd.f32 1e-05, %v1208_v18 }
0x1098   :  { %v1209_v22 = vadd.f32 1e-05, %v1207_v20 }
0x1099   :  { %2844 = vrsqrt.f32 %v1210_v21 }
0x109a   :  { %2846 = vrsqrt.f32 %v1209_v22 }
0x10a3   :  { %v2845_v33 = vpop.eup %2844 }
0x10a4   :  { %v2847_v34 = vpop.eup %2846  ;;  %v1214_v35 = vmul.f32 %v2845_v33, %v1198_v3 }
0x10a5   :  { %v1213_v37 = vmul.f32 %v2847_v34, %v1197_v5 }
0x10a6   :  { %v1220_v38 = vmul.f32 %v1218_v29, %v1214_v35 }
0x10a7   :  { %v1219_v40 = vmul.f32 %v1218_v29, %v1213_v37 }
0x10a8   :  { %v3243_v39 = vadd.f32 %v1224_v36, %v1220_v38 }
0x10a9   :  { %v3249_v41 = vadd.f32 %v1224_v36, %v1219_v40 }
0x10aa   :  { %1241 = vrot.lane.b32.xlu0 %v3243_v39, %s2991_s25  ;;  %1247 = vrot.lane.b32.xlu1 %v3243_v39, %s2998_s14 }
0x10ae   :  { %1251 = vrot.lane.b32.xlu0 %v3249_v41, %s2999_s3  ;;  %1239 = vrot.lane.b32.xlu1 %v3249_v41, %s2991_s25  ;;  %s3006_s25 = smov [#allocation10]  }
0x10af   :  { %s2381_s19 = sshll.u32 %s3006_s25, 4  ;;  %s2382_s19 = int_to_ptr.vmem [resolvable:$true] %s2381_s19 }
0x10b0   :  { %s2960_s20 = scalar_lea.vmem %s2382_s19, 256  ;;  %p2965_p5 = scmp.lt.s32.totalorder %s2382_s19, %s2382_s19 }
0x10b1   :  { %p2961_p4 = scmp.ne.s32.totalorder %s2382_s19, %s2960_s20  ;;  %p2966_p6 = scmp.lt.s32.totalorder %s2960_s20, %s2960_s20 }
0x10b2   :  { %1245 = vrot.lane.b32.xlu1 %v3249_v41, %s2998_s14 }
0x10b3   :  { %p2967_p7 = por %p2966_p6, %p2965_p5 }
0x10b5   :  { %p2968_p8 = pnand %p2967_p7, %p2961_p4 }
0x10b6   :  { %1253 = vrot.lane.b32.xlu1 %v3243_v39, %s2999_s3 }
0x111c   :  { %v1248_v48 = vpop.permute.xlu1 %1247  ;;  %v1242_v43 = vpop.permute.xlu0 %1241 }
0x111d   :  { %v1258_v50 = vsel %vm106_vm0, %v3243_v39, %v1242_v43 }
0x111e   :  { %v1260_v57 = vsel %vm109_vm1, %v1258_v50, %v1248_v48 }
0x1120   :  { %v1240_v44 = vpop.permute.xlu1 %1239  ;;  %v1252_v51 = vpop.permute.xlu0 %1251 }
0x1121   :  { %v1257_v31 = vsel %vm106_vm0, %v3249_v41, %v1240_v44 }
0x1124   :  { %v1246_v45 = vpop.permute.xlu1 %1245 }
0x1125   :  { %v1259_v53 = vsel %vm109_vm1, %v1257_v31, %v1246_v45 }
0x1126   :  { %v1261_v54 = vsel %vm112_vm2, %v1259_v53, %v1252_v51 }
0x1127   :  { %v1263_v56 = vmul.f32 %v2415_v49, %v1261_v54 }
0x1128   :  { %v1254_v58 = vpop.permute.xlu1 %1253 }
0x1129   :  { %v1262_v59 = vsel %vm112_vm2, %v1260_v57, %v1254_v58  ;;  %2639 = vmatprep.mubr.f32.mxu1 %v1263_v56 }
0x112a   :  { %v1264_v60 = vmul.f32 %v2416_v55, %v1262_v59 }
0x112c   :  { %2640 = vmatmul.mubr.f32.vlgmr.msra.gmra.mrb[16].mxu1 %v1264_v60 }
0x112d   :  { %2674 = vmatprep.mubr.msk.f32.mxu1 %vm3001_vm3, %v3000_v30 }
0x11ff   :  { %v3269_v61 = vpop.f32.mrb[16].mxu1 }
0x1200   :  { %v1340_v62 = vpop.f32.mrb[17].mxu1 }
0x1201   :  { %1352 = vrot.lane.b32.xlu0 %v1340_v62, %s3002_s15 }
0x1273   :  { %v1353_v63 = vpop.permute.xlu0 %1352 }
0x1274   :  { %2643 = vmatpush3.xpose.msk.msra.mxu0 %vm204_vm4, %v1353_v63 }
0x1275   :  { %2647 = vmatprep.subr.mxu0 %v3000_v30 }
0x1277   :  { %2645 = vmatmul.mubr.msk.f32.vlgmr.msra.gmra.mrb[8].mxu0 %vm204_vm4, %v1340_v62 }
0x1278   :  { %2649 = vmatprep.mubr.msk.f32.mxu0 %vm3001_vm3, %v3000_v30 }
0x134a   :  { %v1424_v1 = vpop.f32.mrb[8].mxu0 }
0x134b   :  { %v1428_v2 = vmul.f32 0.17677669, %v1424_v1  ;;  %v2646_v3 = vpop.f32.mrb[9].mxu0 }
0x134d   :  { %v1429_v5 = vsel %vm204_vm4, %v1428_v2, -inf }
0x134e   :  { %1430 = vmax.xlane.f32.xlu1 %v1429_v5 }
0x135f   :  { %1518 = vrot.lane.b32.xlu1 %v1340_v62, %s3003_s16 }
0x1363   :  { %1516 = vrot.lane.b32.xlu1 %v1340_v62, %s3004_s17 }
0x1367   :  { %1688 = vrot.lane.b32.xlu1 %v3269_v61, %s3002_s15 }
0x13db   :  { %v1431_v0 = vpop.xlane.xlu1 %1430 }
0x13dc   :  { %v1432_v4 = vsub.f32 %v1428_v2, %v1431_v0 }
0x13de   :  { %v1433_v6 = vmul.f32 1.442695, %v1432_v4 }
0x13df   :  { %v1519_v12 = vpop.permute.xlu1 %1518 }
0x13e0   :  { %2848 = vpow2.f32 %v1433_v6 }
0x13e3   :  { %v1517_v14 = vpop.permute.xlu1 %1516 }
0x13e7   :  { %v1689_v34 = vpop.permute.xlu1 %1688 }
0x13ea   :  { %v2849_v7 = vpop.eup %2848 }
0x13eb   :  { %v1435_v8 = vsel %vm204_vm4, %v2849_v7, 0.0 }
0x13ec   :  { %1436 = vadd.xlane.f32.xlu0 %v1435_v8 }
0x1402   :  { %1440 = vrot.lane.b32.xlu0 %v1340_v62, %s2999_s3 }
0x1479   :  { %v1437_v9 = vpop.xlane.xlu0 %1436 }
0x147a   :  { %2850 = vrcp.f32 %v1437_v9 }
0x147d   :  { %v1441_v10 = vpop.permute.xlu0 %1440 }
0x147e   :  { %2648 = vmatpush3.msra.mxu0 %v1441_v10 }
0x147f   :  { %2652 = vmatprep.subr.mxu0 %v3000_v30 }
0x1484   :  { %v2851_v11 = vpop.eup %2850 }
0x1485   :  { %v1439_v13 = vmul.f32 %v2851_v11, %v2849_v7  ;;  %v2023_v11 = vld [vmem:[#allocation8 + $0xd8] sm:$0xff] }
0x1487   :  { %2650 = vmatmul.mubr.msk.f32.vlgmr.msra.gmra.mrb[10].mxu0 %vm204_vm4, %v1439_v13 }
0x1488   :  { %2653 = vmatpush3.xpose.msk.msra.mxu0 %vm204_vm4, %v1519_v12  ;;  %2654 = vmatprep.mubr.msk.f32.mxu0 %vm3001_vm3, %v3000_v30  ;;  %v2024_v12 = vld [vmem:[#allocation8 + $0xe0] sm:$0xff] }
0x1489   :  { %2657 = vmatprep.subr.mxu0 %v3000_v30 }
0x148b   :  { %2655 = vmatmul.mubr.msk.f32.vlgmr.msra.gmra.mrb[12].mxu0 %vm204_vm4, %v1517_v14 }
0x148c   :  { %2659 = vmatprep.mubr.msk.f32.mxu0 %vm3001_vm3, %v3000_v30 }
0x155a   :  { %v1512_v15 = vpop.f32.mrb[10].mxu0 }
0x155b   :  { %v2651_v16 = vpop.f32.mrb[11].mxu0 }
0x155e   :  { %v1590_v17 = vpop.f32.mrb[12].mxu0 }
0x155f   :  { %v1594_v18 = vmul.f32 0.17677669, %v1590_v17  ;;  %v2656_v19 = vpop.f32.mrb[13].mxu0 }
0x1561   :  { %v1595_v20 = vsel %vm204_vm4, %v1594_v18, -inf }
0x1562   :  { %1596 = vmax.xlane.f32.xlu0 %v1595_v20 }
0x1578   :  { %1606 = vrot.lane.b32.xlu0 %v1340_v62, %s3005_s18 }
0x157c   :  { %1854 = vrot.lane.b32.xlu0 %v3269_v61, %s3003_s16 }
0x15ef   :  { %v1597_v21 = vpop.xlane.xlu0 %1596 }
0x15f0   :  { %v1598_v22 = vsub.f32 %v1594_v18, %v1597_v21 }
0x15f2   :  { %v1599_v27 = vmul.f32 1.442695, %v1598_v22 }
0x15f3   :  { %v1607_v28 = vpop.permute.xlu0 %1606 }
0x15f4   :  { %2852 = vpow2.f32 %v1599_v27  ;;  %2658 = vmatpush3.msra.mxu0 %v1607_v28 }
0x15f5   :  { %2662 = vmatprep.subr.mxu0 %v3000_v30 }
0x15f7   :  { %v1855_v29 = vpop.permute.xlu0 %1854 }
0x15f8   :  { %2673 = vmatpush3.xpose.msk.msra.mxu1 %vm204_vm4, %v1855_v29 }
0x15fe   :  { %v2853_v32 = vpop.eup %2852 }
0x15ff   :  { %v1601_v33 = vsel %vm204_vm4, %v2853_v32, 0.0 }
0x1600   :  { %1602 = vadd.xlane.f32.xlu1 %v1601_v33 }
0x1611   :  { %1852 = vrot.lane.b32.xlu1 %v3269_v61, %s3004_s17 }
0x168d   :  { %v1603_v35 = vpop.xlane.xlu1 %1602 }
0x168e   :  { %2854 = vrcp.f32 %v1603_v35 }
0x1691   :  { %v1853_v36 = vpop.permute.xlu1 %1852 }
0x1692   :  { %2675 = vmatmul.mubr.msk.f32.vlgmr.msra.gmra.mrb[18].mxu1 %vm204_vm4, %v1853_v36 }
0x1698   :  { %v2855_v37 = vpop.eup %2854 }
0x1699   :  { %v1605_v38 = vmul.f32 %v2855_v37, %v2853_v32 }
0x169b   :  { %2660 = vmatmul.mubr.msk.f32.vlgmr.msra.gmra.mrb[14].mxu0 %vm204_vm4, %v1605_v38 }
0x169c   :  { %2663 = vmatpush3.xpose.msk.msra.mxu0 %vm204_vm4, %v1689_v34  ;;  %2664 = vmatprep.mubr.msk.f32.mxu0 %vm3001_vm3, %v3000_v30 }
0x169d   :  { %2667 = vmatprep.subr.mxu0 %v3000_v30 }
0x169f   :  { %2665 = vmatmul.mubr.msk.f32.vlgmr.msra.gmra.mrb[16].mxu0 %vm204_vm4, %v3269_v61 }
0x16a0   :  { %2669 = vmatprep.mubr.msk.f32.mxu0 %vm3001_vm3, %v3000_v30 }
0x1765   :  { %v1926_v40 = vpop.f32.mrb[18].mxu1 }
0x1766   :  { %v1930_v48 = vmul.f32 0.17677669, %v1926_v40  ;;  %v2676_v43 = vpop.f32.mrb[19].mxu1 }
0x1768   :  { %v1931_v44 = vsel %vm204_vm4, %v1930_v48, -inf }
0x1769   :  { %1932 = vmax.xlane.f32.xlu1 %v1931_v44  ;;  %v2151_v44 = vld [vmem:[#allocation8 + $0x80] sm:$0xff] }
0x176e   :  { %v1678_v31 = vpop.f32.mrb[14].mxu0 }
0x176f   :  { %v2661_v45 = vpop.f32.mrb[15].mxu0 }
0x1770   :  { %v2152_v45 = vld [vmem:[#allocation8 + $0x88] sm:$0xff] }
0x1772   :  { %v1760_v49 = vpop.f32.mrb[16].mxu0 }
0x1773   :  { %v1764_v50 = vmul.f32 0.17677669, %v1760_v49  ;;  %v2666_v51 = vpop.f32.mrb[17].mxu0  ;;  %v2153_v49 = vld [vmem:[#allocation8 + $0x90] sm:$0xff] }
0x1774   :  { %v2154_v51 = vld [vmem:[#allocation8 + $0x98] sm:$0xff] }
0x1775   :  { %v1765_v53 = vsel %vm204_vm4, %v1764_v50, -inf }
0x1776   :  { %1766 = vmax.xlane.f32.xlu0 %v1765_v53  ;;  %v2155_v53 = vld [vmem:[#allocation8 + $0xa0] sm:$0xff] }
0x177a   :  { %1776 = vrot.lane.b32.xlu1 %v3269_v61, %s2999_s3 }
0x177e   :  { %1683 = vrot.lane.b32.xlu1 %v1678_v31, %s2995_s13 }
0x17f6   :  { %v1933_v54 = vpop.xlane.xlu1 %1932 }
0x17f7   :  { %v1934_v55 = vsub.f32 %v1930_v48, %v1933_v54  ;;  %v2156_v54 = vld [vmem:[#allocation8 + $0xa8] sm:$0xff] }
0x17f9   :  { %v1935_v56 = vmul.f32 1.442695, %v1934_v55  ;;  %v2791_v55 = vpack.c.bf16 %v2155_v53, %v2154_v51 }
0x17fa   :  { %v1777_v57 = vpop.permute.xlu1 %1776 }
0x17fb   :  { %2856 = vpow2.f32 %v1935_v56  ;;  %2668 = vmatpush3.msra.mxu0 %v1777_v57  ;;  %v2157_v56 = vld [vmem:[#allocation8 + $0xb0] sm:$0xff] }
0x17fc   :  { %2677 = vmatprep.subr.mxu0 %v3000_v30  ;;  %v2795_v57 = vpack.c.bf16 %v2157_v56, %v2156_v54 }
0x17fe   :  { %v1684_v58 = vpop.permute.xlu1 %1683 }
0x17ff   :  { %v1686_v59 = vsel %vm204_vm4, %v1512_v15, %v1684_v58  ;;  %v2158_v58 = vld [vmem:[#allocation8 + $0xb8] sm:$0xff] }
0x1800   :  { %2686 = vmatprep.mubr.msk.f32.mxu1 %vm880_vm5, %v1686_v59  ;;  %v2159_v59 = vld [vmem:[#allocation8 + $0xc0] sm:$0xff] }
0x1803   :  { %v1767_v60 = vpop.xlane.xlu0 %1766 }
0x1804   :  { %v1768_v62 = vsub.f32 %v1764_v50, %v1767_v60  ;;  %v2787_v50 = vpack.c.bf16 %v2153_v49, %v2152_v45  ;;  %v2799_v60 = vpack.c.bf16 %v2159_v59, %v2158_v58 }
0x1805   :  { %v2857_v63 = vpop.eup %2856 }
0x1806   :  { %v1769_v1 = vmul.f32 1.442695, %v1768_v62  ;;  %v1937_v2 = vsel %vm204_vm4, %v2857_v63, 0.0 }
0x1807   :  { %1938 = vadd.xlane.f32.xlu0 %v1937_v2 }
0x1808   :  { %2858 = vpow2.f32 %v1769_v1 }
0x1812   :  { %v2859_v3 = vpop.eup %2858 }
0x1813   :  { %v1771_v5 = vsel %vm204_vm4, %v2859_v3, 0.0 }
0x1814   :  { %1772 = vadd.xlane.f32.xlu0 %v1771_v5 }
0x182a   :  { %1942 = vrot.lane.b32.xlu0 %v3269_v61, %s3005_s18  ;;  %v2779_v61 = vpack.c.bf16 %v2024_v12, %v2023_v11 }
0x182c   :  { %2780 = vmatprep.subr.bf16.mxu1 %v2779_v61 }
0x182d   :  { %2782 = vmatpush3.bf16.msra.mxu1 %v2779_v61 }
0x182e   :  { %2792 = vmatprep.subr.bf16.mxu1 %v2791_v55 }
0x1894   :  { %v1939_v0 = vpop.xlane.xlu0 %1938 }
0x18a1   :  { %v1773_v4 = vpop.xlane.xlu0 %1772 }
0x18a2   :  { %2860 = vrcp.f32 %v1773_v4 }
0x18a3   :  { %2862 = vrcp.f32 %v1939_v0 }
0x18a5   :  { %v1943_v9 = vpop.permute.xlu0 %1942 }
0x18ac   :  { %v2861_v6 = vpop.eup %2860 }
0x18ad   :  { %v1775_v7 = vmul.f32 %v2861_v6, %v2859_v3  ;;  %v2863_v8 = vpop.eup %2862 }
0x18ae   :  { %v1941_v10 = vmul.f32 %v2863_v8, %v2857_v63 }
0x18af   :  { %2670 = vmatmul.mubr.msk.f32.vlgmr.msra.gmra.mrb[18].mxu0 %vm204_vm4, %v1775_v7 }
0x18b0   :  { %2678 = vmatpush3.msra.mxu0 %v1943_v9  ;;  %2679 = vmatprep.mubr.msk.f32.mxu0 %vm3001_vm3, %v3000_v30  ;;  %v3331_v30 = vld [vmem:[#allocation8 + $0xe8] sm:$0xff] }
0x18b1   :  { %v2028_v19 = vrot.slane %v3331_v30, %v878_v47  ;;  %v2141_v0 = vrot.slane %v3331_v30, %v993_v25  ;;  %v2147_v7 = vrot.slane %v3331_v30, %v999_v26  ;;  %v2165_v25 = vrot.slane %v3331_v30, %v1017_v42 }
0x18b2   :  { %v2365_v51 = vrot.slane %v3331_v30, %v1217_v23  ;;  %v2371_v56 = vrot.slane %v3331_v30, %v1223_v24 }
0x18b3   :  { %2680 = vmatmul.mubr.msk.f32.vlgmr.msra.gmra.mrb[20].mxu0 %vm204_vm4, %v1941_v10 }
0x1982   :  { %v1848_v13 = vpop.f32.mrb[18].mxu0 }
0x1983   :  { %v2671_v14 = vpop.f32.mrb[19].mxu0 }
0x1984   :  { %v2161_v14 = vld [vmem:[#allocation8 + $0xd0] sm:$0xff] }
0x1986   :  { %v2014_v15 = vpop.f32.mrb[20].mxu0 }
0x1987   :  { %2019 = vrot.lane.b32.xlu1 %v2014_v15, %s2995_s13  ;;  %v2681_v16 = vpop.f32.mrb[21].mxu0 }
0x19f9   :  { %v2020_v17 = vpop.permute.xlu1 %2019 }
0x19fa   :  { %v2022_v18 = vsel %vm204_vm4, %v1848_v13, %v2020_v17  ;;  %v2160_v13 = vld [vmem:[#allocation8 + $0xc8] sm:$0xff] }
0x19fb   :  { %2687 = vmatmul.mubr.msk.f32.vlgmr.msra.gmra.mrb[20].mxu1 %vm880_vm5, %v2022_v18  ;;  %v2803_v15 = vpack.c.bf16 %v2161_v14, %v2160_v13 }
0x19fc   :  { %2794 = vmatpush3.bf16.msra.mxu1 %v2791_v55 }
0x19fd   :  { %2796 = vmatprep.subr.bf16.mxu1 %v2795_v57 }
0x1a00   :  { %2798 = vmatpush3.bf16.msra.mxu1 %v2795_v57 }
0x1a01   :  { %2800 = vmatprep.subr.bf16.mxu1 %v2799_v60 }
0x1a04   :  { %2802 = vmatpush3.bf16.msra.mxu1 %v2799_v60 }
0x1a05   :  { %2804 = vmatprep.subr.bf16.mxu1 %v2803_v15 }
0x1a08   :  { %2806 = vmatpush3.bf16.msra.mxu1 %v2803_v15 }
0x1ace   :  { %v2688_v20 = vpop.f32.mrb[20].mxu1 }
0x1acf   :  { %v2107_v21 = vadd.f32 %v2688_v20, %v2028_v19  ;;  %v2101_v22 = vpop.f32.mrb[21].mxu1 }
0x1ad0   :  { %v2102_v27 = vadd.f32 %v2101_v22, %v2028_v19 }
0x1ad1   :  { %v2111_v28 = vadd.f32 %v2107_v21, %v3243_v39  ;;  %v2252_v21 = vrot.slane %v3331_v30, %v1104_v52 }
0x1ad2   :  { %v2110_v29 = vadd.f32 %v2102_v27, %v3249_v41  ;;  %v2150_v41 = vld [vmem:[#allocation8 + $0x78] sm:$0xff] }
0x1ad3   :  { %v2115_v32 = vsel %vm106_vm0, %v2111_v28, 0.0  ;;  %v2783_v31 = vpack.c.bf16 %v2151_v44, %v2150_v41 }
0x1ad4   :  { %2116 = vadd.xlane.f32.xlu1 %v2115_v32  ;;  %v2112_v33 = vsel %vm106_vm0, %v2110_v29, 0.0 }
0x1ad5   :  { %2113 = vadd.xlane.f32.xlu0 %v2112_v33  ;;  %2784 = vmatprep.subr.bf16.mxu0 %v2783_v31 }
0x1ad6   :  { %2786 = vmatpush3.bf16.msra.mxu0 %v2783_v31 }
0x1ad7   :  { %2788 = vmatprep.subr.bf16.mxu0 %v2787_v50 }
0x1ada   :  { %2790 = vmatpush3.bf16.msra.mxu0 %v2787_v50 }
0x1b61   :  { %v2117_v34 = vpop.xlane.xlu1 %2116 }
0x1b62   :  { %v2119_v35 = vmul.f32 0.03125, %v2117_v34  ;;  %v2114_v36 = vpop.xlane.xlu0 %2113 }
0x1b63   :  { %v2118_v37 = vmul.f32 0.03125, %v2114_v36 }
0x1b64   :  { %v2121_v38 = vsub.f32 %v2111_v28, %v2119_v35 }
0x1b65   :  { %v2120_v47 = vsub.f32 %v2110_v29, %v2118_v37 }
0x1b66   :  { %v2123_v43 = vmul.f32 %v2121_v38, %v2121_v38 }
0x1b67   :  { %v2122_v40 = vmul.f32 %v2120_v47, %v2120_v47 }
0x1b68   :  { %v2127_v39 = vsel %vm106_vm0, %v2123_v43, 0.0 }
0x1b69   :  { %v2124_v48 = vsel %vm106_vm0, %v2122_v40, 0.0 }
0x1b6a   :  { %2125 = vadd.xlane.f32.xlu0 %v2124_v48 }
0x1b6e   :  { %2128 = vadd.xlane.f32.xlu0 %v2127_v39 }
0x1bf7   :  { %v2126_v62 = vpop.xlane.xlu0 %2125 }
0x1bf8   :  { %v2130_v63 = vmul.f32 0.03125, %v2126_v62 }
0x1bfa   :  { %v2132_v1 = vadd.f32 1e-05, %v2130_v63 }
0x1bfb   :  { %v2129_v2 = vpop.xlane.xlu0 %2128 }
0x1bfc   :  { %2864 = vrsqrt.f32 %v2132_v1  ;;  %v2131_v3 = vmul.f32 0.03125, %v2129_v2 }
0x1bfe   :  { %v2133_v5 = vadd.f32 1e-05, %v2131_v3 }
0x1c00   :  { %2866 = vrsqrt.f32 %v2133_v5 }
0x1c06   :  { %v2865_v4 = vpop.eup %2864 }
0x1c07   :  { %v2136_v6 = vmul.f32 %v2865_v4, %v2120_v47 }
0x1c09   :  { %v2142_v8 = vmul.f32 %v2141_v0, %v2136_v6 }
0x1c0a   :  { %v2867_v9 = vpop.eup %2866 }
0x1c0b   :  { %v2137_v10 = vmul.f32 %v2867_v9, %v2121_v38  ;;  %v2148_v11 = vadd.f32 %v2147_v7, %v2142_v8 }
0x1c0d   :  { %v2143_v12 = vmul.f32 %v2141_v0, %v2137_v10  ;;  %2697 = vmatprep.mubr.msk.f32.mxu0 %vm106_vm0, %v2148_v11 }
0x1c0f   :  { %v2149_v61 = vadd.f32 %v2147_v7, %v2143_v12 }
0x1c11   :  { %2698 = vmatmul.mubr.msk.f32.vlgmr.msra.gmra.mrb[22].mxu0 %vm106_vm0, %v2149_v61 }
0x1ce4   :  { %v2699_v26 = vpop.f32.mrb[22].mxu0 }
0x1ce5   :  { %v2244_v16 = vadd.f32 %v2699_v26, %v2165_v25  ;;  %v2238_v17 = vpop.f32.mrb[23].mxu0 }
0x1ce6   :  { %v2239_v18 = vadd.f32 %v2238_v17, %v2165_v25 }
0x1ce7   :  { %v2248_v20 = vmax.f32 %v2244_v16, 0.0 }
0x1ce8   :  { %v2247_v19 = vmax.f32 %v2239_v18, 0.0 }
0x1cea   :  { %2716 = vmatprep.mubr.msk.f32.mxu1 %vm109_vm1, %v2247_v19 }
0x1ceb   :  { %2717 = vmatmul.mubr.msk.f32.vlgmr.msra.gmra.mrb[22].mxu1 %vm109_vm1, %v2248_v20 }
0x1dbe   :  { %v2718_v22 = vpop.f32.mrb[22].mxu1 }
0x1dbf   :  { %v2331_v27 = vadd.f32 %v2718_v22, %v2252_v21  ;;  %v2325_v28 = vpop.f32.mrb[23].mxu1 }
0x1dc0   :  { %v2326_v29 = vadd.f32 %v2325_v28, %v2252_v21 }
0x1dc1   :  { %v2335_v32 = vadd.f32 %v2331_v27, %v2149_v61 }
0x1dc2   :  { %v2334_v42 = vadd.f32 %v2326_v29, %v2148_v11 }
0x1dc3   :  { %v2339_v33 = vsel %vm106_vm0, %v2335_v32, 0.0 }
0x1dc4   :  { %2340 = vadd.xlane.f32.xlu0 %v2339_v33  ;;  %v2336_v34 = vsel %vm106_vm0, %v2334_v42, 0.0 }
0x1dc5   :  { %2337 = vadd.xlane.f32.xlu1 %v2336_v34 }
0x1e51   :  { %v2341_v35 = vpop.xlane.xlu0 %2340 }
0x1e52   :  { %v2343_v36 = vmul.f32 0.03125, %v2341_v35  ;;  %v2338_v37 = vpop.xlane.xlu1 %2337 }
0x1e53   :  { %v2342_v38 = vmul.f32 0.03125, %v2338_v37 }
0x1e54   :  { %v2345_v47 = vsub.f32 %v2335_v32, %v2343_v36 }
0x1e55   :  { %v2344_v40 = vsub.f32 %v2334_v42, %v2342_v38 }
0x1e56   :  { %v2347_v48 = vmul.f32 %v2345_v47, %v2345_v47 }
0x1e57   :  { %v2346_v52 = vmul.f32 %v2344_v40, %v2344_v40 }
0x1e58   :  { %v2351_v43 = vsel %vm106_vm0, %v2347_v48, 0.0 }
0x1e59   :  { %2352 = vadd.xlane.f32.xlu0 %v2351_v43  ;;  %v2348_v39 = vsel %vm106_vm0, %v2346_v52, 0.0 }
0x1e5a   :  { %2349 = vadd.xlane.f32.xlu1 %v2348_v39 }
0x1ee6   :  { %v2353_v41 = vpop.xlane.xlu0 %2352 }
0x1ee7   :  { %v2355_v44 = vmul.f32 0.03125, %v2353_v41  ;;  %v2350_v31 = vpop.xlane.xlu1 %2349 }
0x1ee8   :  { %v2354_v45 = vmul.f32 0.03125, %v2350_v31 }
0x1ee9   :  { %v2357_v49 = vadd.f32 1e-05, %v2355_v44 }
0x1eea   :  { %v2356_v50 = vadd.f32 1e-05, %v2354_v45 }
0x1eeb   :  { %2868 = vrsqrt.f32 %v2357_v49 }
0x1eec   :  { %2870 = vrsqrt.f32 %v2356_v50 }
0x1ef5   :  { %v2869_v53 = vpop.eup %2868 }
0x1ef6   :  { %v2871_v54 = vpop.eup %2870  ;;  %v2361_v55 = vmul.f32 %v2869_v53, %v2345_v47 }
0x1ef7   :  { %v2360_v57 = vmul.f32 %v2871_v54, %v2344_v40 }
0x1ef8   :  { %v2367_v58 = vmul.f32 %v2365_v51, %v2361_v55 }
0x1ef9   :  { %v2366_v59 = vmul.f32 %v2365_v51, %v2360_v57 }
0x1efa   :  { %v2373_v60 = vadd.f32 %v2371_v56, %v2367_v58 }
0x1efb   :  { %v2372_v62 = vadd.f32 %v2371_v56, %v2366_v59 }
0x1efc   :  { %2375 = vst.msk [vmem:[#allocation10 + $0x8] sm:$0xff] %vm106_vm0, %v2373_v60 }
0x1efd   :  { %2374 = vst.msk [vmem:[#allocation10] sm:$0xff] %vm106_vm0, %v2372_v62 }
0x1efe   :  { %2971 = shalt.err (!%p2968_p8)
}
0x1eff   :  { %s2972_s23 = scalar_lea.hbm %s3389_s4, 256 }
0x1f00   :  { %p2973_p9 = scmp.ne.s32.totalorder %s3389_s4, %s2972_s23  ;;  %p2976_p10 = scmp.lt.u32.totalorder %s2972_s23, %s3389_s4 }
0x1f02   :  { %p2978_p11 = pnand %p2976_p10, %p2973_p9 }
0x1f04   :  { %2981 = shalt.err (!%p2978_p11)
}
0x1f05   :  { %2387 = dma.vmem_to_hbm [thread:$0]  %s2382_s19, 256, %s3389_s4, [#allocation4], %s2994_s1, %s2994_s1, %s2995_s13  }
0x1f06   :  { %2988 = dma.done.wait [#allocation4], 256  }
0x1f07   :  { %2989 = vsyncadd [#allocation4], 4294967040 }
0x1f08   :  { %2391 = vsyncpa [#allocation3], 1 }
0x1f09   :  { %2392 = vsyncpa [#allocation6], 1 }
0x1f0a   :  { %2393 = vsyncpa [#allocation9], 1 }
0x1f0b   :  { %2394 = vsyncpa [#allocation4], 1 }

</bundles_post_ra>
